<compile_context>
chip_gen: v7x
topology: tpu7x:2x2x1
jax: 0.10.0
libtpu: 0.0.40
codegen_flags: <defaults>
</compile_context>

<pallas_src>
import functools

import jax
import jax.numpy as jnp
from jax import lax
from jax.experimental import pallas as pl
from jax.experimental.pallas import tpu as pltpu


# ----------------------------------------------------------------------------
# Chunk picker: rows per output chunk.  Must divide r and be a multiple of 8
# (or be r itself, "full dim").  Tries to give the parallel grid >= 2 steps.
# ----------------------------------------------------------------------------
def _pick_chunk(n_batch, r, row_block):
    if r <= row_block:
        rc = r
    else:
        rc = r                                   # fallback: single big chunk
        cand = (row_block // 8) * 8
        while cand >= 8:
            if r % cand == 0:
                rc = cand
                break
            cand -= 8
    # v7x megacore: make sure the parallel grid has at least 2 steps if we can.
    if n_batch * (r // rc) < 2 and r >= 16 and r % 16 == 0:
        rc = min(rc, r // 2)
    return rc


# ----------------------------------------------------------------------------
# Core Pallas kernel (shared by Conv1d and ConvTranspose1d layers):
#   out[b, l, :] = bias + sum_{d=0..2} xpad[b, l + d, :] @ w_taps[d]
# xpad: (N, R+2, C) halo'd channels-last activation (read ONCE from HBM),
# w_taps: (3, C, Cout), bias: (Cout,)  ->  (N, R, Cout).
# ----------------------------------------------------------------------------
def _halo_tap_matmul(xpad, w_taps, bias, *, out_dtype,
                     compute_dtype=jnp.bfloat16, row_block=1024):
    n, rpad, c = xpad.shape
    r = rpad - 2
    t, c_w, c_out = w_taps.shape
    assert t == 3 and c_w == c

    xpad = xpad.astype(compute_dtype)
    w_taps = w_taps.astype(compute_dtype)
    b2 = bias.reshape(1, c_out).astype(jnp.float32)

    rc = _pick_chunk(n, r, row_block)
    nchunks = r // rc
    grid = (n, nchunks)

    def kernel(x_ref, w_ref, b_ref, o_ref):
        if nchunks == 1:
            start = 0                                    # fully static path
        else:
            start = pl.program_id(1) * rc
            if rc % 8 == 0:
                start = pl.multiple_of(start, 8)
        # Tap views are in-VMEM slices of the single halo'd block — the input
        # is never duplicated in HBM.  Bias folded into the first tap.
        acc = jnp.dot(x_ref[0, pl.ds(start, rc), :], w_ref[0],
                      preferred_element_type=jnp.float32) + b_ref[...]
        acc = acc + jnp.dot(x_ref[0, pl.ds(start + 1, rc), :], w_ref[1],
                            preferred_element_type=jnp.float32)
        acc = acc + jnp.dot(x_ref[0, pl.ds(start + 2, rc), :], w_ref[2],
                            preferred_element_type=jnp.float32)
        o_ref[0] = acc.astype(o_ref.dtype)               # lane-dense store

    comp_is = jnp.dtype(compute_dtype).itemsize
    out_is = jnp.dtype(out_dtype).itemsize
    need = (2 * rpad * c * comp_is                       # input (double buffer)
            + 2 * rc * c_out * out_is                    # output (double buffer)
            + 2 * 3 * c * c_out * comp_is                # weights (resident)
            + 6 * rc * c_out * 4                         # f32 accumulators
            + 2 * c_out * 4 + (1 << 20))                 # bias + slack
    vmem_limit = int(min(64 * 2**20, max(32 * 2**20, 2 * need)))

    cost = pl.CostEstimate(
        flops=2 * 3 * n * r * c * c_out,
        transcendentals=0,
        bytes_accessed=(xpad.size * comp_is + w_taps.size * comp_is
                        + b2.size * 4 + n * r * c_out * out_is))

    return pl.pallas_call(
        kernel,
        out_shape=jax.ShapeDtypeStruct((n, r, c_out), out_dtype),
        grid=grid,
        in_specs=[
            pl.BlockSpec((1, rpad, c), lambda b, i: (b, 0, 0)),   # fetched once/batch
            pl.BlockSpec((3, c, c_out), lambda b, i: (0, 0, 0)),  # resident weights
            pl.BlockSpec((1, c_out), lambda b, i: (0, 0)),
        ],
        out_specs=pl.BlockSpec((1, rc, c_out), lambda b, i: (b, i, 0)),
        compiler_params=pltpu.CompilerParams(
            dimension_semantics=("parallel", "parallel"),
            vmem_limit_bytes=vmem_limit),
        cost_estimate=cost,
    )(xpad, w_taps, b2)


# ----------------------------------------------------------------------------
# Conv1d(Cin, Cout, kernel_size=5, stride=2, padding=2) — channels-last.
# ----------------------------------------------------------------------------
def conv1d_k5s2p2(h, w, b, *, out_dtype, compute_dtype, row_block=1024):
    """h: (N, Lin, Cin); w: (Cout, Cin, 5); b: (Cout,)  ->  (N, Lout, Cout)."""
    n, lin, c_in = h.shape
    if lin % 2:
        raise ValueError(f"stride-2 Conv1d layer requires even length, got {lin}")
    lout = lin // 2
    c_out = w.shape[0]

    # Pack even/odd input phases into channels (free reshape); then
    #   y[l] = b + x[l] @ [W0;W1] + x[l+1] @ [W2;W3] + x[l+2] @ [W4;0]
    # where x = pad_1(reshape(h, (N, Lout, 2*Cin))) and W_k = w[:, :, k].T.
    x = h.reshape(n, lout, 2 * c_in)
    xpad = jnp.pad(x, ((0, 0), (1, 1), (0, 0)))          # 1-row zero halo
    wt = jnp.transpose(w, (2, 1, 0))                     # (5, Cin, Cout)
    zeros = jnp.zeros((c_in, c_out), w.dtype)
    w_taps = jnp.stack([jnp.concatenate([wt[0], wt[1]], axis=0),
                        jnp.concatenate([wt[2], wt[3]], axis=0),
                        jnp.concatenate([wt[4], zeros], axis=0)], axis=0)
    return _halo_tap_matmul(xpad, w_taps, b, out_dtype=out_dtype,
                            compute_dtype=compute_dtype, row_block=row_block)


# ----------------------------------------------------------------------------
# ConvTranspose1d(Cin, Cout, kernel_size=5, stride=2, padding=2, output_padding=1)
# Both output phases from ONE kernel with a fused 2*Cout matmul N dimension.
# ----------------------------------------------------------------------------
def convtr1d_k5s2p2op1(h, w, b, *, out_dtype, compute_dtype, row_block=1024):
    """h: (N, Lin, Cin); w: (Cin, Cout, 5); b: (Cout,)  ->  (N, 2*Lin, Cout).

      y[2m]   = xp[m]@W4 + xp[m+1]@W2 + xp[m+2]@W0 + b
      y[2m+1] =            xp[m+1]@W3 + xp[m+2]@W1 + b      (xp = pad-1 input)
    """
    n, lin, c_in = h.shape
    c_out = w.shape[1]
    xpad = jnp.pad(h, ((0, 0), (1, 1), (0, 0)))          # (N, Lin+2, Cin)
    zeros = jnp.zeros((c_in, c_out), w.dtype)
    w_taps = jnp.stack(
        [jnp.concatenate([w[:, :, 4], zeros], axis=1),
         jnp.concatenate([w[:, :, 2], w[:, :, 3]], axis=1),
         jnp.concatenate([w[:, :, 0], w[:, :, 1]], axis=1)], axis=0)  # (3, Cin, 2*Cout)
    b2 = jnp.concatenate([b, b], axis=0)                 # (2*Cout,)
    y = _halo_tap_matmul(xpad, w_taps, b2, out_dtype=out_dtype,
                         compute_dtype=compute_dtype, row_block=row_block)
    return y.reshape(n, 2 * lin, c_out)                  # free contiguous reshape


# ----------------------------------------------------------------------------
# Full ConvAutoencoder forward (channels-last inside; NCL only at boundaries).
# ----------------------------------------------------------------------------
def conv_autoencoder_forward(x, params, *, compute_dtype=jnp.bfloat16,
                             row_block=1024):
    """x: (N, 1, C, L) -> (N, 1, C, L), matching ConvAutoencoder.forward."""
    # Cast once, BEFORE any glue, so the pad/reshape passes move half the bytes.
    h = jnp.transpose(x[:, 0], (0, 2, 1)).astype(compute_dtype)   # (N, L, C)

    kw = dict(out_dtype=compute_dtype, compute_dtype=compute_dtype,
              row_block=row_block)
    h = conv1d_k5s2p2(h, params["enc0_w"], params["enc0_b"], **kw)
    h = conv1d_k5s2p2(h, params["enc1_w"], params["enc1_b"], **kw)
    h = conv1d_k5s2p2(h, params["enc2_w"], params["enc2_b"], **kw)
    h = convtr1d_k5s2p2op1(h, params["dec0_w"], params["dec0_b"], **kw)
    h = convtr1d_k5s2p2op1(h, params["dec1_w"], params["dec1_b"], **kw)
    # Final layer emitted in f32 to match the PyTorch module's output dtype.
    h = convtr1d_k5s2p2op1(h, params["dec2_w"], params["dec2_b"],
                           out_dtype=jnp.float32, compute_dtype=compute_dtype,
                           row_block=row_block)
    # TODO(synk): adjacent small layers (enc1+enc2 / dec0+dec1) could be fused
    # into one pallas_call keeping the intermediate in VMEM scratch.
    return jnp.transpose(h, (0, 2, 1))[:, None]          # NLC -> NCL, unsqueeze(1)


# ----------------------------------------------------------------------------
# Deterministic parameter init (shapes from the nn.Module __init__).
# ----------------------------------------------------------------------------
def init_params(key, input_channels=18):
    enc = [(input_channels, 64), (64, 128), (128, 256)]
    dec = [(256, 128), (128, 64), (64, input_channels)]
    keys = jax.random.split(key, 12)
    params, ki = {}, 0
    for i, (cin, cout) in enumerate(enc):
        params[f"enc{i}_w"] = 0.05 * jax.random.normal(keys[ki], (cout, cin, 5), jnp.float32)
        params[f"enc{i}_b"] = 0.01 * jax.random.normal(keys[ki + 1], (cout,), jnp.float32)
        ki += 2
    for i, (cin, cout) in enumerate(dec):
        params[f"dec{i}_w"] = 0.05 * jax.random.normal(keys[ki], (cin, cout, 5), jnp.float32)
        params[f"dec{i}_b"] = 0.01 * jax.random.normal(keys[ki + 1], (cout,), jnp.float32)
        ki += 2
    return params


# ----------------------------------------------------------------------------
# Plain-JAX reference (lax convs, HIGHEST precision) for the correctness check.
# ----------------------------------------------------------------------------
def ref_forward(x, params):
    prec = lax.Precision.HIGHEST

    def conv(h, w, b):
        y = lax.conv_general_dilated(h, w, (2,), [(2, 2)],
                                     dimension_numbers=("NCH", "OIH", "NCH"),
                                     precision=prec)
        return y + b[None, :, None]

    def convtr(h, w, b):
        w_f = jnp.flip(jnp.transpose(w, (1, 0, 2)), axis=-1)   # (Cout, Cin, 5)
        y = lax.conv_general_dilated(h, w_f, (1,), [(2, 3)], lhs_dilation=(2,),
                                     dimension_numbers=("NCH", "OIH", "NCH"),
                                     precision=prec)
        return y + b[None, :, None]

    h = x[:, 0]
    h = conv(h, params["enc0_w"], params["enc0_b"])
    h = conv(h, params["enc1_w"], params["enc1_b"])
    h = conv(h, params["enc2_w"], params["enc2_b"])
    h = convtr(h, params["dec0_w"], params["dec0_b"])
    h = convtr(h, params["dec1_w"], params["dec1_b"])
    h = convtr(h, params["dec2_w"], params["dec2_b"])
    return h[:, None]


if __name__ == "__main__":
    key = jax.random.PRNGKey(0)
    k_x, k_p = jax.random.split(key)

    N, C, L = 2, 18, 32                     # small shapes; L divisible by 8
    x = jax.random.normal(k_x, (N, 1, C, L), jnp.float32)
    params = init_params(k_p, input_channels=C)

    ref = jax.block_until_ready(ref_forward(x, params))

    # 1) f32 compute path: validates tap packing / halo indexing.
    fwd_f32 = jax.jit(functools.partial(conv_autoencoder_forward,
                                        compute_dtype=jnp.float32))
    out_f32 = jax.block_until_ready(fwd_f32(x, params))
    assert out_f32.shape == (N, 1, C, L), out_f32.shape
    if not jnp.allclose(out_f32, ref, rtol=2e-2, atol=2e-2):
        raise AssertionError(
            f"f32 mismatch: max abs diff = {float(jnp.max(jnp.abs(out_f32 - ref)))}")

    # 2) Performance path: bf16 operands / bf16 intermediates, f32 accumulation.
    fwd_bf16 = jax.jit(functools.partial(conv_autoencoder_forward,
                                         compute_dtype=jnp.bfloat16))
    out = jax.block_until_ready(fwd_bf16(x, params))
    assert out.shape == (N, 1, C, L), out.shape
    if not jnp.allclose(out, ref, rtol=6e-2, atol=6e-2):
        raise AssertionError(
            f"bf16 mismatch: max abs diff = {float(jnp.max(jnp.abs(out - ref)))}")

    print("KERNEL_OK")
</pallas_src>

<mosaic_0001>
module attributes {stable_mosaic.version = 11 : i64} {
  func.func @kernel(%arg0: i32, %arg1: i32, %arg2: memref<1x18x36xf32, #tpu.memory_space<vmem>>, %arg3: memref<3x36x64xf32, #tpu.memory_space<vmem>>, %arg4: memref<1x64xf32, #tpu.memory_space<vmem>>, %arg5: memref<1x16x64xf32, #tpu.memory_space<vmem>>) attributes {dimension_semantics = [#tpu.dimension_semantics<parallel>, #tpu.dimension_semantics<parallel>], iteration_bounds = array<i64: 2, 1>, scalar_prefetch = 0 : i64, scratch_operands = 0 : i64, tpu.core_type = #tpu.core_type<tc>, window_params = [{transform_indices = @transform_0, window_bounds = array<i64: 1, 18, 36>}, {pipeline_mode = #tpu.pipeline_mode<synchronous>, transform_indices = @transform_1, window_bounds = array<i64: 3, 36, 64>}, {pipeline_mode = #tpu.pipeline_mode<synchronous>, transform_indices = @transform_2, window_bounds = array<i64: 1, 64>}, {transform_indices = @transform_3, window_bounds = array<i64: 1, 16, 64>}]} {
    %c0 = arith.constant 0 : index
    %c0_0 = arith.constant 0 : index
    %c0_1 = arith.constant 0 : index
    %0 = vector.load %arg2[%c0, %c0_0, %c0_1] : memref<1x18x36xf32, #tpu.memory_space<vmem>>, vector<1x16x36xf32>
    %1 = vector.shape_cast %0 : vector<1x16x36xf32> to vector<16x36xf32>
    %c0_2 = arith.constant 0 : index
    %c0_3 = arith.constant 0 : index
    %c0_4 = arith.constant 0 : index
    %2 = vector.load %arg3[%c0_2, %c0_3, %c0_4] : memref<3x36x64xf32, #tpu.memory_space<vmem>>, vector<1x36x64xf32>
    %3 = vector.shape_cast %2 : vector<1x36x64xf32> to vector<36x64xf32>
    %cst = arith.constant dense<0.000000e+00> : vector<16x64xf32>
    %4 = tpu.matmul %1, %3, %cst {dimension_numbers = #tpu.dot_dimension_numbers<[1], [0], [0], [1], [0, 0, 1, 1], [], []>} : vector<16x36xf32>, vector<36x64xf32>, vector<16x64xf32> -> vector<16x64xf32>
    %c0_5 = arith.constant 0 : index
    %c0_6 = arith.constant 0 : index
    %5 = vector.load %arg4[%c0_5, %c0_6] : memref<1x64xf32, #tpu.memory_space<vmem>>, vector<1x64xf32>
    %6 = vector.broadcast %5 : vector<1x64xf32> to vector<16x64xf32>
    %7 = arith.addf %4, %6 : vector<16x64xf32>
    %c0_7 = arith.constant 0 : index
    %c1 = arith.constant 1 : index
    %c0_8 = arith.constant 0 : index
    %8 = vector.load %arg2[%c0_7, %c1, %c0_8] : memref<1x18x36xf32, #tpu.memory_space<vmem>>, vector<1x16x36xf32>
    %9 = vector.shape_cast %8 : vector<1x16x36xf32> to vector<16x36xf32>
    %c1_9 = arith.constant 1 : index
    %c0_10 = arith.constant 0 : index
    %c0_11 = arith.constant 0 : index
    %10 = vector.load %arg3[%c1_9, %c0_10, %c0_11] : memref<3x36x64xf32, #tpu.memory_space<vmem>>, vector<1x36x64xf32>
    %11 = vector.shape_cast %10 : vector<1x36x64xf32> to vector<36x64xf32>
    %cst_12 = arith.constant dense<0.000000e+00> : vector<16x64xf32>
    %12 = tpu.matmul %9, %11, %cst_12 {dimension_numbers = #tpu.dot_dimension_numbers<[1], [0], [0], [1], [0, 0, 1, 1], [], []>} : vector<16x36xf32>, vector<36x64xf32>, vector<16x64xf32> -> vector<16x64xf32>
    %13 = arith.addf %7, %12 : vector<16x64xf32>
    %c0_13 = arith.constant 0 : index
    %c2 = arith.constant 2 : index
    %c0_14 = arith.constant 0 : index
    %14 = vector.load %arg2[%c0_13, %c2, %c0_14] : memref<1x18x36xf32, #tpu.memory_space<vmem>>, vector<1x16x36xf32>
    %15 = vector.shape_cast %14 : vector<1x16x36xf32> to vector<16x36xf32>
    %c2_15 = arith.constant 2 : index
    %c0_16 = arith.constant 0 : index
    %c0_17 = arith.constant 0 : index
    %16 = vector.load %arg3[%c2_15, %c0_16, %c0_17] : memref<3x36x64xf32, #tpu.memory_space<vmem>>, vector<1x36x64xf32>
    %17 = vector.shape_cast %16 : vector<1x36x64xf32> to vector<36x64xf32>
    %cst_18 = arith.constant dense<0.000000e+00> : vector<16x64xf32>
    %18 = tpu.matmul %15, %17, %cst_18 {dimension_numbers = #tpu.dot_dimension_numbers<[1], [0], [0], [1], [0, 0, 1, 1], [], []>} : vector<16x36xf32>, vector<36x64xf32>, vector<16x64xf32> -> vector<16x64xf32>
    %19 = arith.addf %13, %18 : vector<16x64xf32>
    %c0_19 = arith.constant 0 : index
    %c0_20 = arith.constant 0 : index
    %c0_21 = arith.constant 0 : index
    %20 = vector.load %arg5[%c0_19, %c0_20, %c0_21] : memref<1x16x64xf32, #tpu.memory_space<vmem>>, vector<1x16x64xf32>
    %21 = vector.shape_cast %20 : vector<1x16x64xf32> to vector<16x64xf32>
    %22 = vector.shape_cast %19 : vector<16x64xf32> to vector<1x16x64xf32>
    tpu.vector_store %arg5[%c0_19, %c0_20, %c0_21], %22 {strides = array<i32>} : memref<1x16x64xf32, #tpu.memory_space<vmem>>, vector<1x16x64xf32>,
    return
  }
  func.func @transform_0(%arg0: i32, %arg1: i32) -> (i32, i32, i32) {
    %c0_i32 = arith.constant 0 : i32
    %c0_i32_0 = arith.constant 0 : i32
    %c0_i32_1 = arith.constant 0 : i32
    return %arg0, %c0_i32, %c0_i32_0 : i32, i32, i32
  }
  func.func @transform_1(%arg0: i32, %arg1: i32) -> (i32, i32, i32) {
    %c0_i32 = arith.constant 0 : i32
    %c0_i32_0 = arith.constant 0 : i32
    %c0_i32_1 = arith.constant 0 : i32
    %c0_i32_2 = arith.constant 0 : i32
    return %c0_i32, %c0_i32_0, %c0_i32_1 : i32, i32, i32
  }
  func.func @transform_2(%arg0: i32, %arg1: i32) -> (i32, i32) {
    %c0_i32 = arith.constant 0 : i32
    %c0_i32_0 = arith.constant 0 : i32
    %c0_i32_1 = arith.constant 0 : i32
    return %c0_i32, %c0_i32_0 : i32, i32
  }
  func.func @transform_3(%arg0: i32, %arg1: i32) -> (i32, i32, i32) {
    %c0_i32 = arith.constant 0 : i32
    %c0_i32_0 = arith.constant 0 : i32
    return %arg0, %arg1, %c0_i32 : i32, i32, i32
  }
}

module attributes {stable_mosaic.version = 11 : i64} {
  func.func @kernel(%arg0: i32, %arg1: i32, %arg2: memref<1x10x128xf32, #tpu.memory_space<vmem>>, %arg3: memref<3x128x128xf32, #tpu.memory_space<vmem>>, %arg4: memref<1x128xf32, #tpu.memory_space<vmem>>, %arg5: memref<1x8x128xf32, #tpu.memory_space<vmem>>) attributes {dimension_semantics = [#tpu.dimension_semantics<parallel>, #tpu.dimension_semantics<parallel>], iteration_bounds = array<i64: 2, 1>, scalar_prefetch = 0 : i64, scratch_operands = 0 : i64, tpu.core_type = #tpu.core_type<tc>, window_params = [{transform_indices = @transform_0, window_bounds = array<i64: 1, 10, 128>}, {pipeline_mode = #tpu.pipeline_mode<synchronous>, transform_indices = @transform_1, window_bounds = array<i64: 3, 128, 128>}, {pipeline_mode = #tpu.pipeline_mode<synchronous>, transform_indices = @transform_2, window_bounds = array<i64: 1, 128>}, {transform_indices = @transform_3, window_bounds = array<i64: 1, 8, 128>}]} {
    %c0 = arith.constant 0 : index
    %c0_0 = arith.constant 0 : index
    %c0_1 = arith.constant 0 : index
    %0 = vector.load %arg2[%c0, %c0_0, %c0_1] : memref<1x10x128xf32, #tpu.memory_space<vmem>>, vector<1x8x128xf32>
    %1 = vector.shape_cast %0 : vector<1x8x128xf32> to vector<8x128xf32>
    %c0_2 = arith.constant 0 : index
    %c0_3 = arith.constant 0 : index
    %c0_4 = arith.constant 0 : index
    %2 = vector.load %arg3[%c0_2, %c0_3, %c0_4] : memref<3x128x128xf32, #tpu.memory_space<vmem>>, vector<1x128x128xf32>
    %3 = vector.shape_cast %2 : vector<1x128x128xf32> to vector<128x128xf32>
    %cst = arith.constant dense<0.000000e+00> : vector<8x128xf32>
    %4 = tpu.matmul %1, %3, %cst {dimension_numbers = #tpu.dot_dimension_numbers<[1], [0], [0], [1], [0, 0, 1, 1], [], []>} : vector<8x128xf32>, vector<128x128xf32>, vector<8x128xf32> -> vector<8x128xf32>
    %c0_5 = arith.constant 0 : index
    %c0_6 = arith.constant 0 : index
    %5 = vector.load %arg4[%c0_5, %c0_6] : memref<1x128xf32, #tpu.memory_space<vmem>>, vector<1x128xf32>
    %6 = vector.broadcast %5 : vector<1x128xf32> to vector<8x128xf32>
    %7 = arith.addf %4, %6 : vector<8x128xf32>
    %c0_7 = arith.constant 0 : index
    %c1 = arith.constant 1 : index
    %c0_8 = arith.constant 0 : index
    %8 = vector.load %arg2[%c0_7, %c1, %c0_8] : memref<1x10x128xf32, #tpu.memory_space<vmem>>, vector<1x8x128xf32>
    %9 = vector.shape_cast %8 : vector<1x8x128xf32> to vector<8x128xf32>
    %c1_9 = arith.constant 1 : index
    %c0_10 = arith.constant 0 : index
    %c0_11 = arith.constant 0 : index
    %10 = vector.load %arg3[%c1_9, %c0_10, %c0_11] : memref<3x128x128xf32, #tpu.memory_space<vmem>>, vector<1x128x128xf32>
    %11 = vector.shape_cast %10 : vector<1x128x128xf32> to vector<128x128xf32>
    %cst_12 = arith.constant dense<0.000000e+00> : vector<8x128xf32>
    %12 = tpu.matmul %9, %11, %cst_12 {dimension_numbers = #tpu.dot_dimension_numbers<[1], [0], [0], [1], [0, 0, 1, 1], [], []>} : vector<8x128xf32>, vector<128x128xf32>, vector<8x128xf32> -> vector<8x128xf32>
    %13 = arith.addf %7, %12 : vector<8x128xf32>
    %c0_13 = arith.constant 0 : index
    %c2 = arith.constant 2 : index
    %c0_14 = arith.constant 0 : index
    %14 = vector.load %arg2[%c0_13, %c2, %c0_14] : memref<1x10x128xf32, #tpu.memory_space<vmem>>, vector<1x8x128xf32>
    %15 = vector.shape_cast %14 : vector<1x8x128xf32> to vector<8x128xf32>
    %c2_15 = arith.constant 2 : index
    %c0_16 = arith.constant 0 : index
    %c0_17 = arith.constant 0 : index
    %16 = vector.load %arg3[%c2_15, %c0_16, %c0_17] : memref<3x128x128xf32, #tpu.memory_space<vmem>>, vector<1x128x128xf32>
    %17 = vector.shape_cast %16 : vector<1x128x128xf32> to vector<128x128xf32>
    %cst_18 = arith.constant dense<0.000000e+00> : vector<8x128xf32>
    %18 = tpu.matmul %15, %17, %cst_18 {dimension_numbers = #tpu.dot_dimension_numbers<[1], [0], [0], [1], [0, 0, 1, 1], [], []>} : vector<8x128xf32>, vector<128x128xf32>, vector<8x128xf32> -> vector<8x128xf32>
    %19 = arith.addf %13, %18 : vector<8x128xf32>
    %c0_19 = arith.constant 0 : index
    %c0_20 = arith.constant 0 : index
    %c0_21 = arith.constant 0 : index
    %20 = vector.load %arg5[%c0_19, %c0_20, %c0_21] : memref<1x8x128xf32, #tpu.memory_space<vmem>>, vector<1x8x128xf32>
    %21 = vector.shape_cast %20 : vector<1x8x128xf32> to vector<8x128xf32>
    %22 = vector.shape_cast %19 : vector<8x128xf32> to vector<1x8x128xf32>
    tpu.vector_store %arg5[%c0_19, %c0_20, %c0_21], %22 {strides = array<i32>} : memref<1x8x128xf32, #tpu.memory_space<vmem>>, vector<1x8x128xf32>,
    return
  }
  func.func @transform_0(%arg0: i32, %arg1: i32) -> (i32, i32, i32) {
    %c0_i32 = arith.constant 0 : i32
    %c0_i32_0 = arith.constant 0 : i32
    %c0_i32_1 = arith.constant 0 : i32
    return %arg0, %c0_i32, %c0_i32_0 : i32, i32, i32
  }
  func.func @transform_1(%arg0: i32, %arg1: i32) -> (i32, i32, i32) {
    %c0_i32 = arith.constant 0 : i32
    %c0_i32_0 = arith.constant 0 : i32
    %c0_i32_1 = arith.constant 0 : i32
    %c0_i32_2 = arith.constant 0 : i32
    return %c0_i32, %c0_i32_0, %c0_i32_1 : i32, i32, i32
  }
  func.func @transform_2(%arg0: i32, %arg1: i32) -> (i32, i32) {
    %c0_i32 = arith.constant 0 : i32
    %c0_i32_0 = arith.constant 0 : i32
    %c0_i32_1 = arith.constant 0 : i32
    return %c0_i32, %c0_i32_0 : i32, i32
  }
  func.func @transform_3(%arg0: i32, %arg1: i32) -> (i32, i32, i32) {
    %c0_i32 = arith.constant 0 : i32
    %c0_i32_0 = arith.constant 0 : i32
    return %arg0, %arg1, %c0_i32 : i32, i32, i32
  }
}

module attributes {stable_mosaic.version = 11 : i64} {
  func.func @kernel(%arg0: i32, %arg1: i32, %arg2: memref<1x6x256xf32, #tpu.memory_space<vmem>>, %arg3: memref<3x256x256xf32, #tpu.memory_space<vmem>>, %arg4: memref<1x256xf32, #tpu.memory_space<vmem>>, %arg5: memref<1x4x256xf32, #tpu.memory_space<vmem>>) attributes {dimension_semantics = [#tpu.dimension_semantics<parallel>, #tpu.dimension_semantics<parallel>], iteration_bounds = array<i64: 2, 1>, scalar_prefetch = 0 : i64, scratch_operands = 0 : i64, tpu.core_type = #tpu.core_type<tc>, window_params = [{transform_indices = @transform_0, window_bounds = array<i64: 1, 6, 256>}, {pipeline_mode = #tpu.pipeline_mode<synchronous>, transform_indices = @transform_1, window_bounds = array<i64: 3, 256, 256>}, {pipeline_mode = #tpu.pipeline_mode<synchronous>, transform_indices = @transform_2, window_bounds = array<i64: 1, 256>}, {transform_indices = @transform_3, window_bounds = array<i64: 1, 4, 256>}]} {
    %c0 = arith.constant 0 : index
    %c0_0 = arith.constant 0 : index
    %c0_1 = arith.constant 0 : index
    %0 = vector.load %arg2[%c0, %c0_0, %c0_1] : memref<1x6x256xf32, #tpu.memory_space<vmem>>, vector<1x4x256xf32>
    %1 = vector.shape_cast %0 : vector<1x4x256xf32> to vector<4x256xf32>
    %c0_2 = arith.constant 0 : index
    %c0_3 = arith.constant 0 : index
    %c0_4 = arith.constant 0 : index
    %2 = vector.load %arg3[%c0_2, %c0_3, %c0_4] : memref<3x256x256xf32, #tpu.memory_space<vmem>>, vector<1x256x256xf32>
    %3 = vector.shape_cast %2 : vector<1x256x256xf32> to vector<256x256xf32>
    %cst = arith.constant dense<0.000000e+00> : vector<4x256xf32>
    %4 = tpu.matmul %1, %3, %cst {dimension_numbers = #tpu.dot_dimension_numbers<[1], [0], [0], [1], [0, 0, 1, 1], [], []>} : vector<4x256xf32>, vector<256x256xf32>, vector<4x256xf32> -> vector<4x256xf32>
    %c0_5 = arith.constant 0 : index
    %c0_6 = arith.constant 0 : index
    %5 = vector.load %arg4[%c0_5, %c0_6] : memref<1x256xf32, #tpu.memory_space<vmem>>, vector<1x256xf32>
    %6 = vector.broadcast %5 : vector<1x256xf32> to vector<4x256xf32>
    %7 = arith.addf %4, %6 : vector<4x256xf32>
    %c0_7 = arith.constant 0 : index
    %c1 = arith.constant 1 : index
    %c0_8 = arith.constant 0 : index
    %8 = vector.load %arg2[%c0_7, %c1, %c0_8] : memref<1x6x256xf32, #tpu.memory_space<vmem>>, vector<1x4x256xf32>
    %9 = vector.shape_cast %8 : vector<1x4x256xf32> to vector<4x256xf32>
    %c1_9 = arith.constant 1 : index
    %c0_10 = arith.constant 0 : index
    %c0_11 = arith.constant 0 : index
    %10 = vector.load %arg3[%c1_9, %c0_10, %c0_11] : memref<3x256x256xf32, #tpu.memory_space<vmem>>, vector<1x256x256xf32>
    %11 = vector.shape_cast %10 : vector<1x256x256xf32> to vector<256x256xf32>
    %cst_12 = arith.constant dense<0.000000e+00> : vector<4x256xf32>
    %12 = tpu.matmul %9, %11, %cst_12 {dimension_numbers = #tpu.dot_dimension_numbers<[1], [0], [0], [1], [0, 0, 1, 1], [], []>} : vector<4x256xf32>, vector<256x256xf32>, vector<4x256xf32> -> vector<4x256xf32>
    %13 = arith.addf %7, %12 : vector<4x256xf32>
    %c0_13 = arith.constant 0 : index
    %c2 = arith.constant 2 : index
    %c0_14 = arith.constant 0 : index
    %14 = vector.load %arg2[%c0_13, %c2, %c0_14] : memref<1x6x256xf32, #tpu.memory_space<vmem>>, vector<1x4x256xf32>
    %15 = vector.shape_cast %14 : vector<1x4x256xf32> to vector<4x256xf32>
    %c2_15 = arith.constant 2 : index
    %c0_16 = arith.constant 0 : index
    %c0_17 = arith.constant 0 : index
    %16 = vector.load %arg3[%c2_15, %c0_16, %c0_17] : memref<3x256x256xf32, #tpu.memory_space<vmem>>, vector<1x256x256xf32>
    %17 = vector.shape_cast %16 : vector<1x256x256xf32> to vector<256x256xf32>
    %cst_18 = arith.constant dense<0.000000e+00> : vector<4x256xf32>
    %18 = tpu.matmul %15, %17, %cst_18 {dimension_numbers = #tpu.dot_dimension_numbers<[1], [0], [0], [1], [0, 0, 1, 1], [], []>} : vector<4x256xf32>, vector<256x256xf32>, vector<4x256xf32> -> vector<4x256xf32>
    %19 = arith.addf %13, %18 : vector<4x256xf32>
    %c0_19 = arith.constant 0 : index
    %c0_20 = arith.constant 0 : index
    %c0_21 = arith.constant 0 : index
    %20 = vector.load %arg5[%c0_19, %c0_20, %c0_21] : memref<1x4x256xf32, #tpu.memory_space<vmem>>, vector<1x4x256xf32>
    %21 = vector.shape_cast %20 : vector<1x4x256xf32> to vector<4x256xf32>
    %22 = vector.shape_cast %19 : vector<4x256xf32> to vector<1x4x256xf32>
    tpu.vector_store %arg5[%c0_19, %c0_20, %c0_21], %22 {strides = array<i32>} : memref<1x4x256xf32, #tpu.memory_space<vmem>>, vector<1x4x256xf32>,
    return
  }
  func.func @transform_0(%arg0: i32, %arg1: i32) -> (i32, i32, i32) {
    %c0_i32 = arith.constant 0 : i32
    %c0_i32_0 = arith.constant 0 : i32
    %c0_i32_1 = arith.constant 0 : i32
    return %arg0, %c0_i32, %c0_i32_0 : i32, i32, i32
  }
  func.func @transform_1(%arg0: i32, %arg1: i32) -> (i32, i32, i32) {
    %c0_i32 = arith.constant 0 : i32
    %c0_i32_0 = arith.constant 0 : i32
    %c0_i32_1 = arith.constant 0 : i32
    %c0_i32_2 = arith.constant 0 : i32
    return %c0_i32, %c0_i32_0, %c0_i32_1 : i32, i32, i32
  }
  func.func @transform_2(%arg0: i32, %arg1: i32) -> (i32, i32) {
    %c0_i32 = arith.constant 0 : i32
    %c0_i32_0 = arith.constant 0 : i32
    %c0_i32_1 = arith.constant 0 : i32
    return %c0_i32, %c0_i32_0 : i32, i32
  }
  func.func @transform_3(%arg0: i32, %arg1: i32) -> (i32, i32, i32) {
    %c0_i32 = arith.constant 0 : i32
    %c0_i32_0 = arith.constant 0 : i32
    return %arg0, %arg1, %c0_i32 : i32, i32, i32
  }
}

module attributes {stable_mosaic.version = 11 : i64} {
  func.func @kernel(%arg0: i32, %arg1: i32, %arg2: memref<1x18x64xf32, #tpu.memory_space<vmem>>, %arg3: memref<3x64x36xf32, #tpu.memory_space<vmem>>, %arg4: memref<1x36xf32, #tpu.memory_space<vmem>>, %arg5: memref<1x16x36xf32, #tpu.memory_space<vmem>>) attributes {dimension_semantics = [#tpu.dimension_semantics<parallel>, #tpu.dimension_semantics<parallel>], iteration_bounds = array<i64: 2, 1>, scalar_prefetch = 0 : i64, scratch_operands = 0 : i64, tpu.core_type = #tpu.core_type<tc>, window_params = [{transform_indices = @transform_0, window_bounds = array<i64: 1, 18, 64>}, {pipeline_mode = #tpu.pipeline_mode<synchronous>, transform_indices = @transform_1, window_bounds = array<i64: 3, 64, 36>}, {pipeline_mode = #tpu.pipeline_mode<synchronous>, transform_indices = @transform_2, window_bounds = array<i64: 1, 36>}, {transform_indices = @transform_3, window_bounds = array<i64: 1, 16, 36>}]} {
    %c0 = arith.constant 0 : index
    %c0_0 = arith.constant 0 : index
    %c0_1 = arith.constant 0 : index
    %0 = vector.load %arg2[%c0, %c0_0, %c0_1] : memref<1x18x64xf32, #tpu.memory_space<vmem>>, vector<1x16x64xf32>
    %1 = vector.shape_cast %0 : vector<1x16x64xf32> to vector<16x64xf32>
    %c0_2 = arith.constant 0 : index
    %c0_3 = arith.constant 0 : index
    %c0_4 = arith.constant 0 : index
    %2 = vector.load %arg3[%c0_2, %c0_3, %c0_4] : memref<3x64x36xf32, #tpu.memory_space<vmem>>, vector<1x64x36xf32>
    %3 = vector.shape_cast %2 : vector<1x64x36xf32> to vector<64x36xf32>
    %cst = arith.constant dense<0.000000e+00> : vector<16x36xf32>
    %4 = tpu.matmul %1, %3, %cst {dimension_numbers = #tpu.dot_dimension_numbers<[1], [0], [0], [1], [0, 0, 1, 1], [], []>} : vector<16x64xf32>, vector<64x36xf32>, vector<16x36xf32> -> vector<16x36xf32>
    %c0_5 = arith.constant 0 : index
    %c0_6 = arith.constant 0 : index
    %5 = vector.load %arg4[%c0_5, %c0_6] : memref<1x36xf32, #tpu.memory_space<vmem>>, vector<1x36xf32>
    %6 = vector.broadcast %5 : vector<1x36xf32> to vector<16x36xf32>
    %7 = arith.addf %4, %6 : vector<16x36xf32>
    %c0_7 = arith.constant 0 : index
    %c1 = arith.constant 1 : index
    %c0_8 = arith.constant 0 : index
    %8 = vector.load %arg2[%c0_7, %c1, %c0_8] : memref<1x18x64xf32, #tpu.memory_space<vmem>>, vector<1x16x64xf32>
    %9 = vector.shape_cast %8 : vector<1x16x64xf32> to vector<16x64xf32>
    %c1_9 = arith.constant 1 : index
    %c0_10 = arith.constant 0 : index
    %c0_11 = arith.constant 0 : index
    %10 = vector.load %arg3[%c1_9, %c0_10, %c0_11] : memref<3x64x36xf32, #tpu.memory_space<vmem>>, vector<1x64x36xf32>
    %11 = vector.shape_cast %10 : vector<1x64x36xf32> to vector<64x36xf32>
    %cst_12 = arith.constant dense<0.000000e+00> : vector<16x36xf32>
    %12 = tpu.matmul %9, %11, %cst_12 {dimension_numbers = #tpu.dot_dimension_numbers<[1], [0], [0], [1], [0, 0, 1, 1], [], []>} : vector<16x64xf32>, vector<64x36xf32>, vector<16x36xf32> -> vector<16x36xf32>
    %13 = arith.addf %7, %12 : vector<16x36xf32>
    %c0_13 = arith.constant 0 : index
    %c2 = arith.constant 2 : index
    %c0_14 = arith.constant 0 : index
    %14 = vector.load %arg2[%c0_13, %c2, %c0_14] : memref<1x18x64xf32, #tpu.memory_space<vmem>>, vector<1x16x64xf32>
    %15 = vector.shape_cast %14 : vector<1x16x64xf32> to vector<16x64xf32>
    %c2_15 = arith.constant 2 : index
    %c0_16 = arith.constant 0 : index
    %c0_17 = arith.constant 0 : index
    %16 = vector.load %arg3[%c2_15, %c0_16, %c0_17] : memref<3x64x36xf32, #tpu.memory_space<vmem>>, vector<1x64x36xf32>
    %17 = vector.shape_cast %16 : vector<1x64x36xf32> to vector<64x36xf32>
    %cst_18 = arith.constant dense<0.000000e+00> : vector<16x36xf32>
    %18 = tpu.matmul %15, %17, %cst_18 {dimension_numbers = #tpu.dot_dimension_numbers<[1], [0], [0], [1], [0, 0, 1, 1], [], []>} : vector<16x64xf32>, vector<64x36xf32>, vector<16x36xf32> -> vector<16x36xf32>
    %19 = arith.addf %13, %18 : vector<16x36xf32>
    %c0_19 = arith.constant 0 : index
    %c0_20 = arith.constant 0 : index
    %c0_21 = arith.constant 0 : index
    %20 = vector.load %arg5[%c0_19, %c0_20, %c0_21] : memref<1x16x36xf32, #tpu.memory_space<vmem>>, vector<1x16x36xf32>
    %21 = vector.shape_cast %20 : vector<1x16x36xf32> to vector<16x36xf32>
    %22 = vector.shape_cast %19 : vector<16x36xf32> to vector<1x16x36xf32>
    tpu.vector_store %arg5[%c0_19, %c0_20, %c0_21], %22 {strides = array<i32>} : memref<1x16x36xf32, #tpu.memory_space<vmem>>, vector<1x16x36xf32>,
    return
  }
  func.func @transform_0(%arg0: i32, %arg1: i32) -> (i32, i32, i32) {
    %c0_i32 = arith.constant 0 : i32
    %c0_i32_0 = arith.constant 0 : i32
    %c0_i32_1 = arith.constant 0 : i32
    return %arg0, %c0_i32, %c0_i32_0 : i32, i32, i32
  }
  func.func @transform_1(%arg0: i32, %arg1: i32) -> (i32, i32, i32) {
    %c0_i32 = arith.constant 0 : i32
    %c0_i32_0 = arith.constant 0 : i32
    %c0_i32_1 = arith.constant 0 : i32
    %c0_i32_2 = arith.constant 0 : i32
    return %c0_i32, %c0_i32_0, %c0_i32_1 : i32, i32, i32
  }
  func.func @transform_2(%arg0: i32, %arg1: i32) -> (i32, i32) {
    %c0_i32 = arith.constant 0 : i32
    %c0_i32_0 = arith.constant 0 : i32
    %c0_i32_1 = arith.constant 0 : i32
    return %c0_i32, %c0_i32_0 : i32, i32
  }
  func.func @transform_3(%arg0: i32, %arg1: i32) -> (i32, i32, i32) {
    %c0_i32 = arith.constant 0 : i32
    %c0_i32_0 = arith.constant 0 : i32
    return %arg0, %arg1, %c0_i32 : i32, i32, i32
  }
}

</mosaic_0001>

<bundles_post_ra>
// kernel: conv_autoencoder_forward.7
= control target key start
LH: loop header
LB: loop body
LE: loop exit
PB: predicated region body
PF: predicated region fallthrough
CT: control target
= control target key end

     0   :  { %s883_s12 = smov 0   ;;  %s885_s13 = smov 0   ;;  %s1106_s0 = inlined_call_operand.vmem [shape: f32[2,10,128], index: 0, kind: input, shape index: {}]   ;;  %s1107_s1 = inlined_call_operand.vmem [shape: f32[3,128,128], index: 1, kind: input, shape index: {}]   ;;  %s1108_s2 = inlined_call_operand.vmem [shape: f32[1,128], index: 2, kind: input, shape index: {}]   ;;  %s1109_s3 = inlined_call_operand.vmem [shape: f32[2,8,128], index: 3, kind: output, shape index: {}]  }
   0x1   :  { %s887_s14 = smov 0  }
   0x2 LB: > { %s25_s15 = sadd.s32 1, %s854_s13  ;;  %p537_p0 = scmp.ge.s32.totalorder %s858_s14, 1  ;;  %s858_s14 = sphi %s887_s14, %s13_s14   ;;  %s854_s13 = sphi %s885_s13, %s1111_s13   ;;  %s850_s12 = sphi %s883_s12, %s1110_s12  }
   0x3   : > { %p27_p1 = scmp.ge.s32.totalorder %s25_s15, 2  ;;  %p151_p2 = scmp.lt.s32.totalorder %s858_s14, 3 }
   0x5   : > { %s1113_s15 = smov (%p27_p1, %s25_s15), 0  ;;  %p152_p3 = pnand %p537_p0, %p151_p2 }
   0x6   : > { %v542_v0 = vld [vmem:[%s1107_s1 + $0x80] sm:$0xff] (!%p152_p3)  ;;  %v543_v1 = vld [vmem:[%s1107_s1 + $0x88] sm:$0xff] (!%p152_p3)  ;;  %v544_v2 = vld [vmem:[%s1107_s1 + $0x90] sm:$0xff] (!%p152_p3)  ;;  %v860_v3 = vmov (!%p152_p3), 0.0|0.0   ;;  %vm861_vm0 = vmmov (!%p152_p3), 0   ;;  %v862_v6 = vmov (!%p152_p3), 0.0  }
   0x7   : > { %155 = sbr.rel (%p152_p3) target bundleno = 287 (0x11f), region = 32  ;;  %757 = vmatprep.subr.bf16.mxu0 (!%p152_p3), %v860_v3  ;;  %v758_v4 = vpack.c.bf16 (!%p152_p3), %v543_v1, %v542_v0  ;;  %v545_v5 = vld [vmem:[%s1107_s1 + $0x98] sm:$0xff] (!%p152_p3)  ;;  %733 = vmatprep.subr.bf16.mxu1 (!%p152_p3), %v860_v3  ;;  %v546_v8 = vld [vmem:[%s1107_s1 + $0xa0] sm:$0xff] (!%p152_p3)  ;;  %v547_v9 = vld [vmem:[%s1107_s1 + $0xa8] sm:$0xff] (!%p152_p3)  ;;  %p177_p4 = scmp.lt.s32.totalorder (!%p152_p3), %s850_s12, 1 }
   0x8   : > { %695 = vmatprep.mubr.msk.f32.mxu0 (!%p152_p3), %vm861_vm0, %v862_v6  ;;  %660 = vmatprep.mubr.msk.f32.mxu1 (!%p152_p3), %vm861_vm0, %v862_v6  ;;  %v761_v7 = vpack.c.bf16 (!%p152_p3), %v545_v5, %v544_v2  ;;  %v190_v10 = vld [vmem:[%s1107_s1] sm:$0xff] (!%p152_p3)  ;;  %v191_v11 = vld [vmem:[%s1107_s1 + $0x8] sm:$0xff] (!%p152_p3)  ;;  %v192_v13 = vld [vmem:[%s1107_s1 + $0x10] sm:$0xff] (!%p152_p3)  ;;  %v764_v14 = vpack.c.bf16 (!%p152_p3), %v547_v9, %v546_v8 }
   0x9   : > { %759 = vmatpush3.bf16.msra.mxu0 (!%p152_p3), %v758_v4  ;;  %v734_v12 = vpack.c.bf16 (!%p152_p3), %v191_v11, %v190_v10  ;;  %v193_v15 = vld [vmem:[%s1107_s1 + $0x18] sm:$0xff] (!%p152_p3)  ;;  %v548_v16 = vld [vmem:[%s1107_s1 + $0xb0] sm:$0xff] (!%p152_p3)  ;;  %v194_v19 = vld [vmem:[%s1107_s1 + $0x20] sm:$0xff] (!%p152_p3) }
   0xa   : > { %760 = vmatprep.subr.bf16.mxu0 (!%p152_p3), %v860_v3  ;;  %v549_v17 = vld [vmem:[%s1107_s1 + $0xb8] sm:$0xff] (!%p152_p3)  ;;  %v737_v18 = vpack.c.bf16 (!%p152_p3), %v193_v15, %v192_v13  ;;  %v195_v20 = vld [vmem:[%s1107_s1 + $0x28] sm:$0xff] (!%p152_p3)  ;;  %v550_v22 = vld [vmem:[%s1107_s1 + $0xc0] sm:$0xff] (!%p152_p3) }
   0xb   : > { %735 = vmatpush3.bf16.msra.mxu1 (!%p152_p3), %v734_v12  ;;  %v767_v21 = vpack.c.bf16 (!%p152_p3), %v549_v17, %v548_v16  ;;  %v551_v23 = vld [vmem:[%s1107_s1 + $0xc8] sm:$0xff] (!%p152_p3)  ;;  %v740_v24 = vpack.c.bf16 (!%p152_p3), %v195_v20, %v194_v19  ;;  %v196_v25 = vld [vmem:[%s1107_s1 + $0x30] sm:$0xff] (!%p152_p3)  ;;  %v197_v26 = vld [vmem:[%s1107_s1 + $0x38] sm:$0xff] (!%p152_p3) }
   0xc   : > { %736 = vmatprep.subr.bf16.mxu1 (!%p152_p3), %v860_v3  ;;  %v770_v27 = vpack.c.bf16 (!%p152_p3), %v551_v23, %v550_v22  ;;  %v552_v28 = vld [vmem:[%s1107_s1 + $0xd0] sm:$0xff] (!%p152_p3)  ;;  %v553_v29 = vld [vmem:[%s1107_s1 + $0xd8] sm:$0xff] (!%p152_p3)  ;;  %v743_v30 = vpack.c.bf16 (!%p152_p3), %v197_v26, %v196_v25  ;;  %v198_v31 = vld [vmem:[%s1107_s1 + $0x40] sm:$0xff] (!%p152_p3) }
   0xd   : > { %762 = vmatpush3.bf16.msra.mxu0 (!%p152_p3), %v761_v7  ;;  %v199_v32 = vld [vmem:[%s1107_s1 + $0x48] sm:$0xff] (!%p152_p3)  ;;  %v773_v33 = vpack.c.bf16 (!%p152_p3), %v553_v29, %v552_v28  ;;  %v554_v34 = vld [vmem:[%s1107_s1 + $0xe0] sm:$0xff] (!%p152_p3)  ;;  %v200_v37 = vld [vmem:[%s1107_s1 + $0x50] sm:$0xff] (!%p152_p3) }
   0xe   : > { %763 = vmatprep.subr.bf16.mxu0 %v860_v3  ;;  %v555_v35 = vld [vmem:[%s1107_s1 + $0xe8] sm:$0xff]  ;;  %v746_v36 = vpack.c.bf16 %v199_v32, %v198_v31  ;;  %s1115_s12 = smov (!%p177_p4, %s850_s12), 1  ;;  %v201_v38 = vld [vmem:[%s1107_s1 + $0x58] sm:$0xff]  ;;  %v556_v40 = vld [vmem:[%s1107_s1 + $0xf0] sm:$0xff] }
   0xf   : > { %738 = vmatpush3.bf16.msra.mxu1 %v737_v18  ;;  %v776_v39 = vpack.c.bf16 %v555_v35, %v554_v34  ;;  %v557_v41 = vld [vmem:[%s1107_s1 + $0xf8] sm:$0xff]  ;;  %v749_v42 = vpack.c.bf16 %v201_v38, %v200_v37  ;;  %s576_s26 = sshll.u32 %s1115_s12, 4  ;;  %v202_v43 = vld [vmem:[%s1107_s1 + $0x60] sm:$0xff]  ;;  %v203_v44 = vld [vmem:[%s1107_s1 + $0x68] sm:$0xff]  ;;  %s540_s27 = sshll.u32 %s1115_s12, 3 }
  0x10   : > { %739 = vmatprep.subr.bf16.mxu1 %v860_v3  ;;  %v779_v45 = vpack.c.bf16 %v557_v41, %v556_v40  ;;  %s1019_s6 = scalar_lea.vmem %s1106_s0, %s576_s26  ;;  %v558_v46 = vld [vmem:[%s1107_s1 + $0x100] sm:$0xff]  ;;  %v559_v47 = vld [vmem:[%s1107_s1 + $0x108] sm:$0xff]  ;;  %v752_v48 = vpack.c.bf16 %v203_v44, %v202_v43  ;;  %v204_v49 = vld [vmem:[%s1107_s1 + $0x70] sm:$0xff]  ;;  %s188_s30 = scalar_lea.vmem %s1109_s3, %s540_s27 }
  0x11   : > { %765 = vmatpush3.bf16.msra.mxu0 %v764_v14  ;;  %v205_v50 = vld [vmem:[%s1107_s1 + $0x78] sm:$0xff]  ;;  %v283_v51 = vld [vmem:[%s1019_s6 + $0x1] sm:$0xff]  ;;  %v782_v52 = vpack.c.bf16 %v559_v47, %v558_v46  ;;  %v560_v53 = vld [vmem:[%s1107_s1 + $0x110] sm:$0xff] }
  0x12   : > { %766 = vmatprep.subr.bf16.mxu0 %v860_v3  ;;  %v561_v54 = vld [vmem:[%s1107_s1 + $0x118] sm:$0xff]  ;;  %v755_v55 = vpack.c.bf16 %v205_v50, %v204_v49  ;;  %v562_v57 = vld [vmem:[%s1107_s1 + $0x120] sm:$0xff]  ;;  %v563_v58 = vld [vmem:[%s1107_s1 + $0x128] sm:$0xff] }
  0x13   : > { %741 = vmatpush3.bf16.msra.mxu1 %v740_v24  ;;  %v785_v56 = vpack.c.bf16 %v561_v54, %v560_v53  ;;  %v189_v59 = vld [vmem:[%s1019_s6] sm:$0xff]  ;;  %v788_v60 = vpack.c.bf16 %v563_v58, %v562_v57  ;;  %v564_v61 = vld [vmem:[%s1107_s1 + $0x130] sm:$0xff]  ;;  %v565_v62 = vld [vmem:[%s1107_s1 + $0x138] sm:$0xff] }
  0x14   : > { %742 = vmatprep.subr.bf16.mxu1 %v860_v3  ;;  %v791_v63 = vpack.c.bf16 %v565_v62, %v564_v61  ;;  %v566_v0 = vld [vmem:[%s1107_s1 + $0x140] sm:$0xff]  ;;  %v567_v1 = vld [vmem:[%s1107_s1 + $0x148] sm:$0xff]  ;;  %v568_v4 = vld [vmem:[%s1107_s1 + $0x150] sm:$0xff] }
  0x15   : > { %768 = vmatpush3.bf16.msra.mxu0 %v767_v21  ;;  %v794_v2 = vpack.c.bf16 %v567_v1, %v566_v0  ;;  %v569_v5 = vld [vmem:[%s1107_s1 + $0x158] sm:$0xff]  ;;  %v570_v7 = vld [vmem:[%s1107_s1 + $0x160] sm:$0xff]  ;;  %v571_v8 = vld [vmem:[%s1107_s1 + $0x168] sm:$0xff] }
  0x16   : > { %769 = vmatprep.subr.bf16.mxu0 %v860_v3  ;;  %v800_v9 = vpack.c.bf16 %v571_v8, %v570_v7  ;;  %v572_v10 = vld [vmem:[%s1107_s1 + $0x170] sm:$0xff]  ;;  %v573_v11 = vld [vmem:[%s1107_s1 + $0x178] sm:$0xff]  ;;  %v372_v13 = vld [vmem:[%s1019_s6 + $0x2] sm:$0xff] }
  0x17   : > { %744 = vmatpush3.bf16.msra.mxu1 %v743_v30  ;;  %v803_v12 = vpack.c.bf16 %v573_v11, %v572_v10  ;;  %v541_v16 = vld [vmem:[%s1108_s2] ss:$0 sm:$0xff] }
  0x18   : > { %745 = vmatprep.subr.bf16.mxu1 %v860_v3 }
  0x19   : > { %771 = vmatpush3.bf16.msra.mxu0 %v770_v27 }
  0x1a   : > { %772 = vmatprep.subr.bf16.mxu0 %v860_v3 }
  0x1b   : > { %747 = vmatpush3.bf16.msra.mxu1 %v746_v36 }
  0x1c   : > { %748 = vmatprep.subr.bf16.mxu1 %v860_v3 }
  0x1d   : > { %774 = vmatpush3.bf16.msra.mxu0 %v773_v33 }
  0x1e   : > { %775 = vmatprep.subr.bf16.mxu0 %v860_v3 }
  0x1f   : > { %750 = vmatpush3.bf16.msra.mxu1 %v749_v42 }
  0x20   : > { %751 = vmatprep.subr.bf16.mxu1 %v860_v3 }
  0x21   : > { %777 = vmatpush3.bf16.msra.mxu0 %v776_v39 }
  0x22   : > { %778 = vmatprep.subr.bf16.mxu0 %v860_v3 }
  0x23   : > { %753 = vmatpush3.bf16.msra.mxu1 %v752_v48 }
  0x24   : > { %754 = vmatprep.subr.bf16.mxu1 %v860_v3 }
  0x25   : > { %780 = vmatpush3.bf16.msra.mxu0 %v779_v45 }
  0x26   : > { %781 = vmatprep.subr.bf16.mxu0 %v860_v3 }
  0x27   : > { %756 = vmatpush3.bf16.msra.mxu1 %v755_v55 }
  0x28   : > { %696 = vmatmul.mubr.f32.vlgmr.msra.gmra.mrb[0].mxu0 %v283_v51 }
  0x29   : > { %783 = vmatpush3.bf16.msra.mxu0 %v782_v52  ;;  %730 = vmatprep.mubr.msk.f32.mxu0 %vm861_vm0, %v862_v6  ;;  %v797_v6 = vpack.c.bf16 %v569_v5, %v568_v4 }
  0x2a   : > { %784 = vmatprep.subr.bf16.mxu0 %v860_v3  ;;  %661 = vmatmul.mubr.f32.vlgmr.msra.gmra.mrb[0].mxu1 %v189_v59 }
  0x2d   : > { %786 = vmatpush3.bf16.msra.mxu0 %v785_v56 }
  0x2e   : > { %787 = vmatprep.subr.bf16.mxu0 %v860_v3 }
  0x31   : > { %789 = vmatpush3.bf16.msra.mxu0 %v788_v60 }
  0x32   : > { %790 = vmatprep.subr.bf16.mxu0 %v860_v3 }
  0x35   : > { %792 = vmatpush3.bf16.msra.mxu0 %v791_v63 }
  0x36   : > { %793 = vmatprep.subr.bf16.mxu0 %v860_v3 }
  0x39   : > { %795 = vmatpush3.bf16.msra.mxu0 %v794_v2 }
  0x3a   : > { %796 = vmatprep.subr.bf16.mxu0 %v860_v3 }
  0x3d   : > { %798 = vmatpush3.bf16.msra.mxu0 %v797_v6 }
  0x3e   : > { %799 = vmatprep.subr.bf16.mxu0 %v860_v3 }
  0x41   : > { %801 = vmatpush3.bf16.msra.mxu0 %v800_v9 }
  0x42   : > { %802 = vmatprep.subr.bf16.mxu0 %v860_v3 }
  0x45   : > { %804 = vmatpush3.bf16.msra.mxu0 %v803_v12 }
  0x48   : > { %731 = vmatmul.mubr.f32.vlgmr.msra.gmra.mrb[0].mxu0 %v372_v13 }
  0xfd   : > { %v279_v14 = vpop.f32.mrb[0].mxu1 }
  0xfe   : > { %v662_v15 = vpop.f32.mrb[1].mxu1  ;;  %v280_v17 = vadd.f32 %v541_v16, %v279_v14 }
 0x11b   : > { %v456_v18 = vpop.f32.mrb[0].mxu0 }
 0x11c   : > { %v806_v19 = vadd.f32 %v456_v18, %v280_v17  ;;  %v732_v20 = vpop.f32.mrb[1].mxu0 }
 0x11e   : > { %461 = vst [vmem:[%s188_s30] sm:$0xff] %v806_v19 }
 0x11f PF: > { %s13_s14 = sadd.s32 1, %s858_s14   ;;  %s1110_s12 = smov %s854_s13 }
 0x120   : > { %p10_p5 = scmp.ge.s32.totalorder %s13_s14, 4   ;;  %s1111_s13 = smov %s1113_s15 }
 0x122   :  { %12 = sbr.rel (!%p10_p5) target bundleno = 2 (0x2), region = 64 }

// kernel: conv_autoencoder_forward.6
= control target key start
LH: loop header
LB: loop body
LE: loop exit
PB: predicated region body
PF: predicated region fallthrough
CT: control target
= control target key end

     0   :  { %s756_s12 = smov 0   ;;  %s758_s13 = smov 0   ;;  %s861_s0 = inlined_call_operand.vmem [shape: f32[2,18,36], index: 0, kind: input, shape index: {}]   ;;  %s862_s1 = inlined_call_operand.vmem [shape: f32[3,36,64], index: 1, kind: input, shape index: {}]   ;;  %s863_s2 = inlined_call_operand.vmem [shape: f32[1,64], index: 2, kind: input, shape index: {}]   ;;  %s864_s3 = inlined_call_operand.vmem [shape: f32[2,16,64], index: 3, kind: output, shape index: {}]  }
   0x1   :  { %s760_s14 = smov 0  }
   0x2 LB: > { %s25_s15 = sadd.s32 1, %s730_s13  ;;  %p570_p0 = scmp.ge.s32.totalorder %s734_s14, 1  ;;  %s734_s14 = sphi %s760_s14, %s13_s14   ;;  %s730_s13 = sphi %s758_s13, %s866_s13   ;;  %s726_s12 = sphi %s756_s12, %s865_s12  }
   0x3   : > { %p27_p1 = scmp.ge.s32.totalorder %s25_s15, 2  ;;  %p151_p2 = scmp.lt.s32.totalorder %s734_s14, 3 }
   0x5   : > { %s868_s15 = smov (%p27_p1, %s25_s15), 0  ;;  %p152_p3 = pnand %p570_p0, %p151_p2 }
   0x6   : > { %v578_v0 = vld [vmem:[%s862_s1 + $0x28] sm:$0xff] (!%p152_p3)  ;;  %v579_v1 = vld [vmem:[%s862_s1 + $0x30] sm:$0xff] (!%p152_p3)  ;;  %v580_v2 = vld [vmem:[%s862_s1 + $0x38] sm:$0xff] (!%p152_p3)  ;;  %p179_p4 = scmp.lt.s32.totalorder (!%p152_p3), %s726_s12, 1  ;;  %vm208_vm0 = vcmask (!%p152_p3), 293888   ;;  %vm215_vm1 = vcmask (!%p152_p3), 1043456  }
   0x7   : > { %155 = sbr.rel (%p152_p3) target bundleno = 246 (0xf6), region = 32  ;;  %v665_v3 = vpack.c.bf16 (!%p152_p3), %v579_v1, %v578_v0  ;;  %v581_v4 = vld [vmem:[%s862_s1 + $0x40] sm:$0xff] (!%p152_p3)  ;;  %v197_v6 = vld [vmem:[%s862_s1 + $0x8] sm:$0xff] (!%p152_p3)  ;;  %v198_v9 = vld [vmem:[%s862_s1 + $0x10] sm:$0xff] (!%p152_p3)  ;;  %vm482_vm2 = vcmask (!%p152_p3), 523264  }
   0x8   : > { %v196_v5 = vld [vmem:[%s862_s1] sm:$0xff] (!%p152_p3)  ;;  %v669_v7 = vpack.c.bf16 (!%p152_p3), %v581_v4, %v580_v2  ;;  %v199_v10 = vld [vmem:[%s862_s1 + $0x18] sm:$0xff] (!%p152_p3)  ;;  %v582_v12 = vld [vmem:[%s862_s1 + $0x48] sm:$0xf] (!%p152_p3) }
   0x9   : > { %v657_v8 = vpack.c.bf16 (!%p152_p3), %v197_v6, %v196_v5  ;;  %666 = vmatprep.subr.bf16.mxu0 (!%p152_p3), %v665_v3  ;;  %v661_v11 = vpack.c.bf16 (!%p152_p3), %v199_v10, %v198_v9  ;;  %v586_v13 = vld [vmem:[%s862_s1 + $0x50] sm:$0xff] (!%p152_p3)  ;;  %v587_v14 = vld [vmem:[%s862_s1 + $0x58] sm:$0xff] (!%p152_p3)  ;;  %v200_v16 = vld [vmem:[%s862_s1 + $0x20] sm:$0xf] (!%p152_p3) }
   0xa   : > { %668 = vmatpush3.bf16.msra.mxu0 (!%p152_p3), %v665_v3  ;;  %v588_v18 = vld [vmem:[%s862_s1 + $0x60] sm:$0xff] (!%p152_p3)  ;;  %v589_v19 = vld [vmem:[%s862_s1 + $0x68] sm:$0xff] (!%p152_p3)  ;;  %v673_v20 = vpack.c.bf16 (!%p152_p3), %v587_v14, %v586_v13  ;;  %v590_v25 = vld [vmem:[%s862_s1 + $0x70] sm:$0xf] (!%p152_p3) }
   0xb   : > { %658 = vmatprep.subr.bf16.mxu1 (!%p152_p3), %v657_v8  ;;  %670 = vmatprep.subr.bf16.mxu0 (!%p152_p3), %v669_v7  ;;  %v677_v22 = vpack.c.bf16 (!%p152_p3), %v589_v19, %v588_v18  ;;  %v574_v29 = vld [vmem:[%s863_s2] ss:$0 sm:$0xff] (!%p152_p3) }
   0xc   : > { %660 = vmatpush3.bf16.msra.mxu1 (!%p152_p3), %v657_v8 }
   0xd   : > { %662 = vmatprep.subr.bf16.mxu1 (!%p152_p3), %v661_v11 }
   0xe   : > { %s870_s12 = smov (!%p179_p4, %s726_s12), 1  ;;  %672 = vmatpush3.bf16.msra.mxu0 %v669_v7 }
   0xf   : > { %s687_s5 = smul.u32 24, %s870_s12  ;;  %639 = vmatprep.subr.msk.mxu0 %vm215_vm1, %v582_v12  ;;  %s596_s29 = sshll.u32 %s870_s12, 4 }
  0x10   : > { %664 = vmatpush3.bf16.msra.mxu1 %v661_v11 }
  0x11   : > { %s807_s10 = scalar_lea.vmem %s861_s0, %s687_s5  ;;  %626 = vmatprep.subr.msk.mxu1 %vm215_vm1, %v200_v16  ;;  %s192_s5 = scalar_lea.vmem %s864_s3, %s596_s29 }
  0x12   : > { %v294_v15 = vld [vmem:[%s807_s10 + $0x1] sm:$0xff]  ;;  %v295_v21 = vld [vmem:[%s807_s10 + $0x9] sm:$0xff]  ;;  %640 = vmatpush3.msk.msra.mxu0 %vm215_vm1, %v582_v12 }
  0x13   : > { %v194_v17 = vld [vmem:[%s807_s10] sm:$0xff]  ;;  %641 = vmatprep.mubr.msk.f32.mxu0 %vm208_vm0, %v294_v15  ;;  %v195_v23 = vld [vmem:[%s807_s10 + $0x8] sm:$0xff]  ;;  %674 = vmatprep.subr.bf16.mxu0 %v673_v20 }
  0x14   : > { %628 = vmatprep.mubr.msk.f32.mxu1 %vm208_vm0, %v194_v17  ;;  %642 = vmatmul.mubr.msk.f32.vlgmr.msra.gmra.mrb[0].mxu0 %vm208_vm0, %v295_v21  ;;  %v388_v24 = vld [vmem:[%s807_s10 + $0x2] sm:$0xff]  ;;  %v389_v26 = vld [vmem:[%s807_s10 + $0xa] sm:$0xff] }
  0x15   : > { %676 = vmatpush3.bf16.msra.mxu0 %v673_v20  ;;  %627 = vmatpush3.msk.msra.mxu1 %vm215_vm1, %v200_v16 }
  0x16   : > { %678 = vmatprep.subr.bf16.mxu0 %v677_v22  ;;  %629 = vmatmul.mubr.msk.f32.vlgmr.msra.gmra.mrb[0].mxu1 %vm208_vm0, %v195_v23 }
  0x17   : > { %654 = vmatprep.mubr.msk.f32.mxu0 %vm208_vm0, %v388_v24 }
  0x19   : > { %680 = vmatpush3.bf16.msra.mxu0 %v677_v22 }
  0x1a   : > { %652 = vmatprep.subr.msk.mxu0 %vm215_vm1, %v590_v25 }
  0x1d   : > { %653 = vmatpush3.msk.msra.mxu0 %vm215_vm1, %v590_v25 }
  0x1e   : > { %655 = vmatmul.mubr.msk.f32.vlgmr.msra.gmra.mrb[0].mxu0 %vm208_vm0, %v389_v26 }
  0xe9   : > { %v630_v27 = vpop.f32.mrb[0].mxu1 }
  0xea   : > { %v285_v28 = vpop.f32.mrb[1].mxu1  ;;  %v291_v30 = vadd.f32 %v630_v27, %v574_v29 }
  0xeb   : > { %v286_v31 = vadd.f32 %v574_v29, %v285_v28 }
  0xf1   : > { %v656_v32 = vpop.f32.mrb[0].mxu0 }
  0xf2   : > { %v682_v33 = vadd.f32 %v656_v32, %v291_v30  ;;  %v471_v34 = vpop.f32.mrb[1].mxu0 }
  0xf3   : > { %v684_v35 = vadd.f32 %v471_v34, %v286_v31 }
  0xf4   : > { %484 = vst.msk [vmem:[%s192_s5 + $0x8] sm:$0xff] %vm482_vm2, %v682_v33 }
  0xf5   : > { %483 = vst.msk [vmem:[%s192_s5] sm:$0xff] %vm482_vm2, %v684_v35 }
  0xf6 PF: > { %s13_s14 = sadd.s32 1, %s734_s14   ;;  %s865_s12 = smov %s730_s13 }
  0xf7   : > { %p10_p5 = scmp.ge.s32.totalorder %s13_s14, 4   ;;  %s866_s13 = smov %s868_s15 }
  0xf9   :  { %12 = sbr.rel (!%p10_p5) target bundleno = 2 (0x2), region = 64 }

// kernel: conv_autoencoder_forward.8
= control target key start
LH: loop header
LB: loop body
LE: loop exit
PB: predicated region body
PF: predicated region fallthrough
CT: control target
= control target key end

     0   :  { %s1129_s12 = smov 0   ;;  %s1131_s13 = smov 0   ;;  %s1757_s0 = inlined_call_operand.vmem [shape: f32[2,6,256], index: 0, kind: input, shape index: {}]   ;;  %s1758_s1 = inlined_call_operand.vmem [shape: f32[3,256,256], index: 1, kind: input, shape index: {}]   ;;  %s1759_s2 = inlined_call_operand.vmem [shape: f32[1,256], index: 2, kind: input, shape index: {}]   ;;  %s1760_s3 = inlined_call_operand.vmem [shape: f32[2,4,256], index: 3, kind: output, shape index: {}]  }
   0x1   :  { %s1133_s14 = smov 0  }
   0x2 LB: > { %s25_s15 = sadd.s32 1, %s1103_s13  ;;  %p726_p0 = scmp.ge.s32.totalorder %s1107_s14, 1  ;;  %s1107_s14 = sphi %s1133_s14, %s13_s14   ;;  %s1103_s13 = sphi %s1131_s13, %s1762_s13   ;;  %s1099_s12 = sphi %s1129_s12, %s1761_s12  }
   0x3   : > { %p27_p1 = scmp.ge.s32.totalorder %s25_s15, 2  ;;  %p151_p2 = scmp.lt.s32.totalorder %s1107_s14, 3 }
   0x5   : > { %s1764_s15 = smov (%p27_p1, %s25_s15), 0  ;;  %p152_p3 = pnand %p726_p0, %p151_p2 }
   0x6   : > { %v732_v0 = vld [vmem:[%s1758_s1 + $0x208] sm:$0xff] (!%p152_p3)  ;;  %v734_v1 = vld [vmem:[%s1758_s1 + $0x218] sm:$0xff] (!%p152_p3)  ;;  %v731_v2 = vld [vmem:[%s1758_s1 + $0x200] sm:$0xff] (!%p152_p3)  ;;  %p179_p4 = scmp.lt.s32.totalorder (!%p152_p3), %s1099_s12, 1 }
   0x7   : > { %155 = sbr.rel (%p152_p3) target bundleno = 355 (0x163), region = 32  ;;  %v927_v3 = vpack.c.bf16 (!%p152_p3), %v734_v1, %v732_v0  ;;  %v733_v4 = vld [vmem:[%s1758_s1 + $0x210] sm:$0xff] (!%p152_p3)  ;;  %v736_v5 = vld [vmem:[%s1758_s1 + $0x228] sm:$0xff] (!%p152_p3)  ;;  %v738_v6 = vld [vmem:[%s1758_s1 + $0x238] sm:$0xff] (!%p152_p3) }
   0x8   : > { %v929_v7 = vpack.c.bf16 (!%p152_p3), %v733_v4, %v731_v2  ;;  %v931_v8 = vpack.c.bf16 (!%p152_p3), %v738_v6, %v736_v5  ;;  %v735_v9 = vld [vmem:[%s1758_s1 + $0x220] sm:$0xff] (!%p152_p3)  ;;  %v737_v10 = vld [vmem:[%s1758_s1 + $0x230] sm:$0xff] (!%p152_p3)  ;;  %v740_v11 = vld [vmem:[%s1758_s1 + $0x248] sm:$0xff] (!%p152_p3) }
   0x9   : > { %928 = vmatprep.subr.bf16.mxu0 (!%p152_p3), %v927_v3  ;;  %v742_v12 = vld [vmem:[%s1758_s1 + $0x258] sm:$0xff] (!%p152_p3)  ;;  %v933_v13 = vpack.c.bf16 (!%p152_p3), %v737_v10, %v735_v9  ;;  %v739_v15 = vld [vmem:[%s1758_s1 + $0x240] sm:$0xff] (!%p152_p3)  ;;  %v741_v16 = vld [vmem:[%s1758_s1 + $0x250] sm:$0xff] (!%p152_p3) }
   0xa   : > { %930 = vmatpush1.bf16.msra.mxu0 (!%p152_p3), %v929_v7  ;;  %v935_v14 = vpack.c.bf16 (!%p152_p3), %v742_v12, %v740_v11  ;;  %v744_v17 = vld [vmem:[%s1758_s1 + $0x268] sm:$0xff] (!%p152_p3)  ;;  %v746_v18 = vld [vmem:[%s1758_s1 + $0x278] sm:$0xff] (!%p152_p3)  ;;  %v937_v19 = vpack.c.bf16 (!%p152_p3), %v741_v16, %v739_v15  ;;  %v743_v21 = vld [vmem:[%s1758_s1 + $0x260] sm:$0xff] (!%p152_p3) }
   0xb   : > { %932 = vmatprep.subr.bf16.mxu0 (!%p152_p3), %v931_v8  ;;  %v939_v20 = vpack.c.bf16 (!%p152_p3), %v746_v18, %v744_v17  ;;  %v745_v22 = vld [vmem:[%s1758_s1 + $0x270] sm:$0xff] (!%p152_p3)  ;;  %v748_v23 = vld [vmem:[%s1758_s1 + $0x288] sm:$0xff] (!%p152_p3)  ;;  %v750_v24 = vld [vmem:[%s1758_s1 + $0x298] sm:$0xff] (!%p152_p3) }
   0xc   : > { %v941_v25 = vpack.c.bf16 (!%p152_p3), %v745_v22, %v743_v21  ;;  %v943_v26 = vpack.c.bf16 (!%p152_p3), %v750_v24, %v748_v23  ;;  %v747_v27 = vld [vmem:[%s1758_s1 + $0x280] sm:$0xff] (!%p152_p3)  ;;  %v749_v28 = vld [vmem:[%s1758_s1 + $0x290] sm:$0xff] (!%p152_p3)  ;;  %v752_v29 = vld [vmem:[%s1758_s1 + $0x2a8] sm:$0xff] (!%p152_p3) }
   0xd   : > { %v754_v30 = vld [vmem:[%s1758_s1 + $0x2b8] sm:$0xff] (!%p152_p3)  ;;  %v945_v31 = vpack.c.bf16 (!%p152_p3), %v749_v28, %v747_v27  ;;  %v751_v33 = vld [vmem:[%s1758_s1 + $0x2a0] sm:$0xff] (!%p152_p3)  ;;  %v753_v34 = vld [vmem:[%s1758_s1 + $0x2b0] sm:$0xff] (!%p152_p3) }
   0xe   : > { %934 = vmatpush1.bf16.msra.mxu0 %v933_v13  ;;  %s1766_s12 = smov (!%p179_p4, %s1099_s12), 1  ;;  %v947_v32 = vpack.c.bf16 %v754_v30, %v752_v29  ;;  %v756_v35 = vld [vmem:[%s1758_s1 + $0x2c8] sm:$0xff]  ;;  %v758_v36 = vld [vmem:[%s1758_s1 + $0x2d8] sm:$0xff]  ;;  %v949_v37 = vpack.c.bf16 %v753_v34, %v751_v33  ;;  %v755_v38 = vld [vmem:[%s1758_s1 + $0x2c0] sm:$0xff] }
   0xf   : > { %936 = vmatprep.subr.bf16.mxu0 %v935_v14  ;;  %s861_s10 = sshll.u32 %s1766_s12, 4  ;;  %v757_v39 = vld [vmem:[%s1758_s1 + $0x2d0] sm:$0xff]  ;;  %v196_v40 = vld [vmem:[%s1758_s1 + $0x8] sm:$0xff]  ;;  %v951_v41 = vpack.c.bf16 %v758_v36, %v756_v35  ;;  %v762_v43 = vld [vmem:[%s1758_s1 + $0x2f8] sm:$0xff] }
  0x10   : > { %s1235_s25 = scalar_lea.vmem %s1757_s0, %s861_s10  ;;  %v760_v42 = vld [vmem:[%s1758_s1 + $0x2e8] sm:$0xff]  ;;  %v198_v44 = vld [vmem:[%s1758_s1 + $0x18] sm:$0xff]  ;;  %v195_v46 = vld [vmem:[%s1758_s1] sm:$0xff]  ;;  %v953_v52 = vpack.c.bf16 %v757_v39, %v755_v38 }
  0x11   : > { %v863_v45 = vpack.c.bf16 %v198_v44, %v196_v40  ;;  %v197_v47 = vld [vmem:[%s1758_s1 + $0x10] sm:$0xff]  ;;  %v343_v48 = vld [vmem:[%s1235_s25 + $0x8] sm:$0x1e]  ;;  %v759_v53 = vld [vmem:[%s1758_s1 + $0x2e0] sm:$0xff]  ;;  %v955_v55 = vpack.c.bf16 %v762_v43, %v760_v42 }
  0x12   : > { %938 = vmatpush1.bf16.msra.mxu0 %v937_v19  ;;  %v865_v49 = vpack.c.bf16 %v197_v47, %v195_v46  ;;  %v412_v50 = vrot.slane %v343_v48, 1  ;;  %v200_v51 = vld [vmem:[%s1758_s1 + $0x28] sm:$0xff]  ;;  %v202_v54 = vld [vmem:[%s1758_s1 + $0x38] sm:$0xff]  ;;  %v761_v56 = vld [vmem:[%s1758_s1 + $0x2f0] sm:$0xff] }
  0x13   : > { %940 = vmatprep.subr.bf16.mxu0 %v939_v20  ;;  %864 = vmatprep.subr.bf16.mxu1 %v863_v45  ;;  %v867_v57 = vpack.c.bf16 %v202_v54, %v200_v51  ;;  %v199_v58 = vld [vmem:[%s1758_s1 + $0x20] sm:$0xff]  ;;  %v201_v59 = vld [vmem:[%s1758_s1 + $0x30] sm:$0xff]  ;;  %v764_v60 = vld [vmem:[%s1758_s1 + $0x308] sm:$0xff]  ;;  %v957_v1 = vpack.c.bf16 %v761_v56, %v759_v53 }
  0x14   : > { %866 = vmatpush1.bf16.msra.mxu1 %v865_v49  ;;  %v766_v61 = vld [vmem:[%s1758_s1 + $0x318] sm:$0xff]  ;;  %479 = vmatprep.mubr.f32.mxu0 %v412_v50  ;;  %v869_v62 = vpack.c.bf16 %v201_v59, %v199_v58  ;;  %v204_v63 = vld [vmem:[%s1758_s1 + $0x48] sm:$0xff]  ;;  %v763_v2 = vld [vmem:[%s1758_s1 + $0x300] sm:$0xff] }
  0x15   : > { %868 = vmatprep.subr.bf16.mxu1 %v867_v57  ;;  %v206_v0 = vld [vmem:[%s1758_s1 + $0x58] sm:$0xff]  ;;  %v203_v4 = vld [vmem:[%s1758_s1 + $0x40] sm:$0xff]  ;;  %v205_v5 = vld [vmem:[%s1758_s1 + $0x50] sm:$0xff]  ;;  %v959_v6 = vpack.c.bf16 %v766_v61, %v764_v60 }
  0x16   : > { %942 = vmatpush1.bf16.msra.mxu0 %v941_v25  ;;  %v871_v3 = vpack.c.bf16 %v206_v0, %v204_v63  ;;  %v765_v7 = vld [vmem:[%s1758_s1 + $0x310] sm:$0xff]  ;;  %v873_v8 = vpack.c.bf16 %v205_v5, %v203_v4  ;;  %v208_v9 = vld [vmem:[%s1758_s1 + $0x68] sm:$0xff]  ;;  %v210_v10 = vld [vmem:[%s1758_s1 + $0x78] sm:$0xff] }
  0x17   : > { %944 = vmatprep.subr.bf16.mxu0 %v943_v26  ;;  %v768_v11 = vld [vmem:[%s1758_s1 + $0x328] sm:$0xff]  ;;  %v770_v12 = vld [vmem:[%s1758_s1 + $0x338] sm:$0xff]  ;;  %v875_v13 = vpack.c.bf16 %v210_v10, %v208_v9  ;;  %v207_v14 = vld [vmem:[%s1758_s1 + $0x60] sm:$0xff]  ;;  %v961_v16 = vpack.c.bf16 %v765_v7, %v763_v2 }
  0x18   : > { %870 = vmatpush1.bf16.msra.mxu1 %v869_v62  ;;  %v209_v15 = vld [vmem:[%s1758_s1 + $0x70] sm:$0xff]  ;;  %v212_v17 = vld [vmem:[%s1758_s1 + $0x88] sm:$0xff]  ;;  %v214_v18 = vld [vmem:[%s1758_s1 + $0x98] sm:$0xff]  ;;  %v963_v19 = vpack.c.bf16 %v770_v12, %v768_v11 }
  0x19   : > { %872 = vmatprep.subr.bf16.mxu1 %v871_v3  ;;  %v767_v20 = vld [vmem:[%s1758_s1 + $0x320] sm:$0xff]  ;;  %v769_v21 = vld [vmem:[%s1758_s1 + $0x330] sm:$0xff]  ;;  %v772_v22 = vld [vmem:[%s1758_s1 + $0x348] sm:$0xff]  ;;  %v877_v23 = vpack.c.bf16 %v209_v15, %v207_v14  ;;  %v879_v25 = vpack.c.bf16 %v214_v18, %v212_v17 }
  0x1a   : > { %946 = vmatpush1.bf16.msra.mxu0 %v945_v31  ;;  %v774_v24 = vld [vmem:[%s1758_s1 + $0x358] sm:$0xff]  ;;  %v211_v26 = vld [vmem:[%s1758_s1 + $0x80] sm:$0xff]  ;;  %v213_v27 = vld [vmem:[%s1758_s1 + $0x90] sm:$0xff]  ;;  %v965_v30 = vpack.c.bf16 %v769_v21, %v767_v20 }
  0x1b   : > { %948 = vmatprep.subr.bf16.mxu0 %v947_v32  ;;  %v216_v28 = vld [vmem:[%s1758_s1 + $0xa8] sm:$0xff]  ;;  %v218_v29 = vld [vmem:[%s1758_s1 + $0xb8] sm:$0xff]  ;;  %v967_v31 = vpack.c.bf16 %v774_v24, %v772_v22  ;;  %v771_v32 = vld [vmem:[%s1758_s1 + $0x340] sm:$0xff]  ;;  %v881_v35 = vpack.c.bf16 %v213_v27, %v211_v26 }
  0x1c   : > { %874 = vmatpush1.bf16.msra.mxu1 %v873_v8  ;;  %v773_v33 = vld [vmem:[%s1758_s1 + $0x350] sm:$0xff]  ;;  %v776_v34 = vld [vmem:[%s1758_s1 + $0x368] sm:$0xff]  ;;  %v778_v36 = vld [vmem:[%s1758_s1 + $0x378] sm:$0xff] }
  0x1d   : > { %876 = vmatprep.subr.bf16.mxu1 %v875_v13  ;;  %v215_v38 = vld [vmem:[%s1758_s1 + $0xa0] sm:$0xff]  ;;  %v217_v39 = vld [vmem:[%s1758_s1 + $0xb0] sm:$0xff]  ;;  %v220_v40 = vld [vmem:[%s1758_s1 + $0xc8] sm:$0xff]  ;;  %v969_v42 = vpack.c.bf16 %v773_v33, %v771_v32  ;;  %v971_v43 = vpack.c.bf16 %v778_v36, %v776_v34 }
  0x1e   : > { %950 = vmatpush1.bf16.msra.mxu0 %v949_v37  ;;  %v883_v37 = vpack.c.bf16 %v218_v29, %v216_v28  ;;  %v775_v44 = vld [vmem:[%s1758_s1 + $0x360] sm:$0xff]  ;;  %v777_v45 = vld [vmem:[%s1758_s1 + $0x370] sm:$0xff]  ;;  %v780_v46 = vld [vmem:[%s1758_s1 + $0x388] sm:$0xff]  ;;  %v885_v47 = vpack.c.bf16 %v217_v39, %v215_v38 }
  0x1f   : > { %952 = vmatprep.subr.bf16.mxu0 %v951_v41  ;;  %v222_v41 = vld [vmem:[%s1758_s1 + $0xd8] sm:$0xff]  ;;  %v219_v50 = vld [vmem:[%s1758_s1 + $0xc0] sm:$0xff]  ;;  %v221_v51 = vld [vmem:[%s1758_s1 + $0xd0] sm:$0xff]  ;;  %v973_v54 = vpack.c.bf16 %v777_v45, %v775_v44 }
  0x20   : > { %878 = vmatpush1.bf16.msra.mxu1 %v877_v23  ;;  %v782_v48 = vld [vmem:[%s1758_s1 + $0x398] sm:$0xff]  ;;  %v887_v49 = vpack.c.bf16 %v222_v41, %v220_v40  ;;  %v779_v56 = vld [vmem:[%s1758_s1 + $0x380] sm:$0xff]  ;;  %v781_v57 = vld [vmem:[%s1758_s1 + $0x390] sm:$0xff]  ;;  %v889_v59 = vpack.c.bf16 %v221_v51, %v219_v50 }
  0x21   : > { %880 = vmatprep.subr.bf16.mxu1 %v879_v25  ;;  %v226_v53 = vld [vmem:[%s1758_s1 + $0xf8] sm:$0xff]  ;;  %v784_v58 = vld [vmem:[%s1758_s1 + $0x3a8] sm:$0xff]  ;;  %v223_v62 = vld [vmem:[%s1758_s1 + $0xe0] sm:$0xff]  ;;  %v977_v2 = vpack.c.bf16 %v781_v57, %v779_v56 }
  0x22   : > { %954 = vmatpush1.bf16.msra.mxu0 %v953_v52  ;;  %v224_v52 = vld [vmem:[%s1758_s1 + $0xe8] sm:$0xff]  ;;  %v786_v60 = vld [vmem:[%s1758_s1 + $0x3b8] sm:$0xff]  ;;  %v225_v63 = vld [vmem:[%s1758_s1 + $0xf0] sm:$0xff] }
  0x23   : > { %956 = vmatprep.subr.bf16.mxu0 %v955_v55  ;;  %v975_v55 = vpack.c.bf16 %v782_v48, %v780_v46  ;;  %v891_v61 = vpack.c.bf16 %v226_v53, %v224_v52  ;;  %v228_v0 = vld [vmem:[%s1758_s1 + $0x108] sm:$0xff]  ;;  %v979_v3 = vpack.c.bf16 %v786_v60, %v784_v58  ;;  %v783_v4 = vld [vmem:[%s1758_s1 + $0x3a0] sm:$0xff]  ;;  %v785_v5 = vld [vmem:[%s1758_s1 + $0x3b0] sm:$0xff]  ;;  %v893_v7 = vpack.c.bf16 %v225_v63, %v223_v62 }
  0x24   : > { %882 = vmatpush1.bf16.msra.mxu1 %v881_v35  ;;  %v790_v8 = vld [vmem:[%s1758_s1 + $0x3d8] sm:$0xff]  ;;  %v227_v10 = vld [vmem:[%s1758_s1 + $0x100] sm:$0xff]  ;;  %v229_v11 = vld [vmem:[%s1758_s1 + $0x110] sm:$0xff]  ;;  %v981_v14 = vpack.c.bf16 %v785_v5, %v783_v4 }
  0x25   : > { %884 = vmatprep.subr.bf16.mxu1 %v883_v37  ;;  %v232_v12 = vld [vmem:[%s1758_s1 + $0x128] sm:$0xff]  ;;  %v234_v13 = vld [vmem:[%s1758_s1 + $0x138] sm:$0xff]  ;;  %v789_v17 = vld [vmem:[%s1758_s1 + $0x3d0] sm:$0xff] }
  0x26   : > { %958 = vmatpush1.bf16.msra.mxu0 %v957_v1  ;;  %v230_v1 = vld [vmem:[%s1758_s1 + $0x118] sm:$0xff]  ;;  %v792_v18 = vld [vmem:[%s1758_s1 + $0x3e8] sm:$0xff]  ;;  %v899_v21 = vpack.c.bf16 %v234_v13, %v232_v12  ;;  %v231_v22 = vld [vmem:[%s1758_s1 + $0x120] sm:$0xff] }
  0x27   : > { %960 = vmatprep.subr.bf16.mxu0 %v959_v6  ;;  %v788_v6 = vld [vmem:[%s1758_s1 + $0x3c8] sm:$0xff]  ;;  %v895_v9 = vpack.c.bf16 %v230_v1, %v228_v0  ;;  %v794_v20 = vld [vmem:[%s1758_s1 + $0x3f8] sm:$0xff]  ;;  %v233_v23 = vld [vmem:[%s1758_s1 + $0x130] sm:$0xff] }
  0x28   : > { %886 = vmatpush1.bf16.msra.mxu1 %v885_v47  ;;  %v983_v15 = vpack.c.bf16 %v790_v8, %v788_v6  ;;  %v236_v24 = vld [vmem:[%s1758_s1 + $0x148] sm:$0xff]  ;;  %v238_v25 = vld [vmem:[%s1758_s1 + $0x158] sm:$0xff]  ;;  %v987_v27 = vpack.c.bf16 %v794_v20, %v792_v18  ;;  %v791_v28 = vld [vmem:[%s1758_s1 + $0x3e0] sm:$0xff] }
  0x29   : > { %888 = vmatprep.subr.bf16.mxu1 %v887_v49  ;;  %v793_v29 = vld [vmem:[%s1758_s1 + $0x3f0] sm:$0xff]  ;;  %v798_v32 = vld [vmem:[%s1758_s1 + $0x418] sm:$0xff]  ;;  %v903_v33 = vpack.c.bf16 %v238_v25, %v236_v24  ;;  %v235_v34 = vld [vmem:[%s1758_s1 + $0x140] sm:$0xff] }
  0x2a   : > { %962 = vmatpush1.bf16.msra.mxu0 %v961_v16  ;;  %v787_v16 = vld [vmem:[%s1758_s1 + $0x3c0] sm:$0xff]  ;;  %v237_v35 = vld [vmem:[%s1758_s1 + $0x150] sm:$0xff]  ;;  %v240_v36 = vld [vmem:[%s1758_s1 + $0x168] sm:$0xff]  ;;  %v989_v38 = vpack.c.bf16 %v793_v29, %v791_v28 }
  0x2b   : > { %964 = vmatprep.subr.bf16.mxu0 %v963_v19  ;;  %v897_v19 = vpack.c.bf16 %v229_v11, %v227_v10  ;;  %v985_v26 = vpack.c.bf16 %v789_v17, %v787_v16  ;;  %v242_v37 = vld [vmem:[%s1758_s1 + $0x178] sm:$0xff]  ;;  %v342_v39 = vld [vmem:[%s1235_s25] sm:$0x1e]  ;;  %v905_v44 = vpack.c.bf16 %v237_v35, %v235_v34  ;;  %v241_v48 = vld [vmem:[%s1758_s1 + $0x170] sm:$0xff] }
  0x2c   : > { %890 = vmatpush1.bf16.msra.mxu1 %v889_v59  ;;  %v795_v41 = vld [vmem:[%s1758_s1 + $0x400] sm:$0xff]  ;;  %v802_v45 = vld [vmem:[%s1758_s1 + $0x438] sm:$0xff]  ;;  %v907_v46 = vpack.c.bf16 %v242_v37, %v240_v36  ;;  %v411_v49 = vrot.slane %v342_v39, 1  ;;  %v244_v50 = vld [vmem:[%s1758_s1 + $0x188] sm:$0xff] }
  0x2d   : > { %892 = vmatprep.subr.bf16.mxu1 %v891_v61  ;;  %v239_v47 = vld [vmem:[%s1758_s1 + $0x160] sm:$0xff]  ;;  %v246_v51 = vld [vmem:[%s1758_s1 + $0x198] sm:$0xff]  ;;  %v194_v52 = vld [vmem:[%s1235_s25 + $0x8] sm:$0xf] }
  0x2e   : > { %966 = vmatpush1.bf16.msra.mxu0 %v965_v30  ;;  %v796_v30 = vld [vmem:[%s1758_s1 + $0x408] sm:$0xff]  ;;  %335 = vmatprep.mubr.f32.mxu1 %v194_v52  ;;  %v801_v56 = vld [vmem:[%s1758_s1 + $0x430] sm:$0xff]  ;;  %v909_v58 = vpack.c.bf16 %v241_v48, %v239_v47  ;;  %v806_v60 = vld [vmem:[%s1758_s1 + $0x458] sm:$0xff]  ;;  %v911_v61 = vpack.c.bf16 %v246_v51, %v244_v50 }
  0x2f   : > { %968 = vmatprep.subr.bf16.mxu0 %v967_v31  ;;  %v901_v31 = vpack.c.bf16 %v233_v23, %v231_v22  ;;  %v991_v40 = vpack.c.bf16 %v798_v32, %v796_v30  ;;  %v804_v57 = vld [vmem:[%s1758_s1 + $0x448] sm:$0xff]  ;;  %v243_v62 = vld [vmem:[%s1758_s1 + $0x180] sm:$0xff]  ;;  %v245_v63 = vld [vmem:[%s1758_s1 + $0x190] sm:$0xff] }
  0x30   : > { %894 = vmatpush1.bf16.msra.mxu1 %v893_v7  ;;  %v489_v59 = vld [vmem:[%s1235_s25 + $0x8] sm:$0x3c]  ;;  %v999_v4 = vpack.c.bf16 %v806_v60, %v804_v57  ;;  %v803_v5 = vld [vmem:[%s1758_s1 + $0x440] sm:$0xff]  ;;  %v805_v6 = vld [vmem:[%s1758_s1 + $0x450] sm:$0xff]  ;;  %v913_v8 = vpack.c.bf16 %v245_v63, %v243_v62 }
  0x31   : > { %896 = vmatprep.subr.bf16.mxu1 %v895_v9  ;;  %v558_v0 = vrot.slane %v489_v59, 2  ;;  %v248_v1 = vld [vmem:[%s1758_s1 + $0x1a8] sm:$0xff]  ;;  %v810_v9 = vld [vmem:[%s1758_s1 + $0x478] sm:$0xff]  ;;  %v247_v11 = vld [vmem:[%s1758_s1 + $0x1a0] sm:$0xff] }
  0x32   : > { %970 = vmatpush1.bf16.msra.mxu0 %v969_v42  ;;  %v797_v42 = vld [vmem:[%s1758_s1 + $0x410] sm:$0xff]  ;;  %v808_v7 = vld [vmem:[%s1758_s1 + $0x468] sm:$0xff]  ;;  %v807_v17 = vld [vmem:[%s1758_s1 + $0x460] sm:$0xff] }
  0x33   : > { %972 = vmatprep.subr.bf16.mxu0 %v971_v43  ;;  %v800_v43 = vld [vmem:[%s1758_s1 + $0x428] sm:$0xff]  ;;  %v993_v53 = vpack.c.bf16 %v797_v42, %v795_v41  ;;  %v249_v12 = vld [vmem:[%s1758_s1 + $0x1b0] sm:$0xff]  ;;  %v1003_v16 = vpack.c.bf16 %v810_v9, %v808_v7  ;;  %v251_v23 = vld [vmem:[%s1758_s1 + $0x1c0] sm:$0xff] }
  0x34   : > { %898 = vmatpush1.bf16.msra.mxu1 %v897_v19  ;;  %v252_v13 = vld [vmem:[%s1758_s1 + $0x1c8] sm:$0xff]  ;;  %v809_v18 = vld [vmem:[%s1758_s1 + $0x470] sm:$0xff]  ;;  %v917_v20 = vpack.c.bf16 %v249_v12, %v247_v11  ;;  %v811_v29 = vld [vmem:[%s1758_s1 + $0x480] sm:$0xff] }
  0x35   : > { %900 = vmatprep.subr.bf16.mxu1 %v899_v21  ;;  %v812_v19 = vld [vmem:[%s1758_s1 + $0x488] sm:$0xff]  ;;  %v814_v21 = vld [vmem:[%s1758_s1 + $0x498] sm:$0xff]  ;;  %v253_v24 = vld [vmem:[%s1758_s1 + $0x1d0] sm:$0xff] }
  0x36   : > { %974 = vmatpush1.bf16.msra.mxu0 %v973_v54  ;;  %v799_v54 = vld [vmem:[%s1758_s1 + $0x420] sm:$0xff]  ;;  %v256_v25 = vld [vmem:[%s1758_s1 + $0x1e8] sm:$0xff]  ;;  %v1007_v28 = vpack.c.bf16 %v814_v21, %v812_v19  ;;  %v813_v30 = vld [vmem:[%s1758_s1 + $0x490] sm:$0xff]  ;;  %v921_v32 = vpack.c.bf16 %v253_v24, %v251_v23 }
  0x37   : > { %976 = vmatprep.subr.bf16.mxu0 %v975_v55  ;;  %v995_v55 = vpack.c.bf16 %v802_v45, %v800_v43  ;;  %v255_v35 = vld [vmem:[%s1758_s1 + $0x1e0] sm:$0xff]  ;;  %v257_v36 = vld [vmem:[%s1758_s1 + $0x1f0] sm:$0xff]  ;;  %v1009_v37 = vpack.c.bf16 %v813_v30, %v811_v29  ;;  %v820_v42 = vld [vmem:[%s1758_s1 + $0x4c8] sm:$0xff] }
  0x38   : > { %902 = vmatpush1.bf16.msra.mxu1 %v901_v31  ;;  %v816_v31 = vld [vmem:[%s1758_s1 + $0x4a8] sm:$0xff]  ;;  %v815_v39 = vld [vmem:[%s1758_s1 + $0x4a0] sm:$0xff]  ;;  %v925_v41 = vpack.c.bf16 %v257_v36, %v255_v35  ;;  %v822_v43 = vld [vmem:[%s1758_s1 + $0x4d8] sm:$0xff] }
  0x39   : > { %904 = vmatprep.subr.bf16.mxu1 %v903_v33  ;;  %v818_v33 = vld [vmem:[%s1758_s1 + $0x4b8] sm:$0xff]  ;;  %v1015_v45 = vpack.c.bf16 %v822_v43, %v820_v42  ;;  %v821_v47 = vld [vmem:[%s1758_s1 + $0x4d0] sm:$0xff]  ;;  %v193_v48 = vld [vmem:[%s1235_s25] sm:$0xf] }
  0x3a   : > { %978 = vmatpush1.bf16.msra.mxu0 %v977_v2  ;;  %v250_v2 = vld [vmem:[%s1758_s1 + $0x1b8] sm:$0xff]  ;;  %v827_v59 = vld [vmem:[%s1758_s1 + $0x500] sm:$0xff]  ;;  %v829_v60 = vld [vmem:[%s1758_s1 + $0x510] sm:$0xff] }
  0x3b   : > { %980 = vmatprep.subr.bf16.mxu0 %v979_v3  ;;  %v997_v3 = vpack.c.bf16 %v801_v56, %v799_v54  ;;  %v915_v10 = vpack.c.bf16 %v250_v2, %v248_v1  ;;  %v826_v50 = vld [vmem:[%s1758_s1 + $0x4f8] sm:$0xff]  ;;  %v825_v54 = vld [vmem:[%s1758_s1 + $0x4f0] sm:$0xff]  ;;  %v1025_v63 = vpack.c.bf16 %v829_v60, %v827_v59  ;;  %v831_v1 = vld [vmem:[%s1758_s1 + $0x520] sm:$0xff] }
  0x3c   : > { %906 = vmatpush1.bf16.msra.mxu1 %v905_v44  ;;  %v830_v56 = vld [vmem:[%s1758_s1 + $0x518] sm:$0xff]  ;;  %v833_v2 = vld [vmem:[%s1758_s1 + $0x530] sm:$0xff]  ;;  %v835_v7 = vld [vmem:[%s1758_s1 + $0x540] sm:$0xff] }
  0x3d   : > { %908 = vmatprep.subr.bf16.mxu1 %v907_v46  ;;  %v819_v46 = vld [vmem:[%s1758_s1 + $0x4c0] sm:$0xff]  ;;  %v834_v62 = vld [vmem:[%s1758_s1 + $0x538] sm:$0xff]  ;;  %v840_v9 = vld [vmem:[%s1758_s1 + $0x568] sm:$0xff] }
  0x3e   : > { %982 = vmatpush1.bf16.msra.mxu0 %v981_v14  ;;  %v254_v14 = vld [vmem:[%s1758_s1 + $0x1d8] sm:$0xff]  ;;  %v1017_v51 = vpack.c.bf16 %v821_v47, %v819_v46  ;;  %v843_v19 = vld [vmem:[%s1758_s1 + $0x580] sm:$0xff]  ;;  %v848_v21 = vld [vmem:[%s1758_s1 + $0x5a8] sm:$0xff] }
  0x3f   : > { %984 = vmatprep.subr.bf16.mxu0 %v983_v15  ;;  %v1001_v15 = vpack.c.bf16 %v805_v6, %v803_v5  ;;  %v919_v22 = vpack.c.bf16 %v254_v14, %v252_v13  ;;  %v1029_v5 = vpack.c.bf16 %v833_v2, %v831_v1  ;;  %v839_v13 = vld [vmem:[%s1758_s1 + $0x560] sm:$0xff]  ;;  %v841_v14 = vld [vmem:[%s1758_s1 + $0x570] sm:$0xff] }
  0x40   : > { %910 = vmatpush1.bf16.msra.mxu1 %v909_v58  ;;  %v259_v47 = vld [vmem:[%s1759_s2] sm:$0x3] }
  0x41   : > { %912 = vmatprep.subr.bf16.mxu1 %v911_v61  ;;  %v832_v61 = vld [vmem:[%s1758_s1 + $0x528] sm:$0xff] }
  0x42   : > { %986 = vmatpush1.bf16.msra.mxu0 %v985_v26  ;;  %v258_v26 = vld [vmem:[%s1758_s1 + $0x1f8] sm:$0xff] }
  0x43   : > { %988 = vmatprep.subr.bf16.mxu0 %v987_v27  ;;  %v1005_v27 = vpack.c.bf16 %v809_v18, %v807_v17  ;;  %v923_v34 = vpack.c.bf16 %v258_v26, %v256_v25  ;;  %v1037_v17 = vpack.c.bf16 %v841_v14, %v839_v13  ;;  %v847_v25 = vld [vmem:[%s1758_s1 + $0x5a0] sm:$0xff]  ;;  %v849_v26 = vld [vmem:[%s1758_s1 + $0x5b0] sm:$0xff] }
  0x44   : > { %914 = vmatpush1.bf16.msra.mxu1 %v913_v8  ;;  %v837_v8 = vld [vmem:[%s1758_s1 + $0x550] sm:$0xff]  ;;  %v1045_v29 = vpack.c.bf16 %v849_v26, %v847_v25 }
  0x45   : > { %916 = vmatprep.subr.bf16.mxu1 %v915_v10  ;;  %v842_v10 = vld [vmem:[%s1758_s1 + $0x578] sm:$0xff]  ;;  %v1033_v11 = vpack.c.bf16 %v837_v8, %v835_v7 }
  0x46   : > { %990 = vmatpush1.bf16.msra.mxu0 %v989_v38  ;;  %v1011_v38 = vpack.c.bf16 %v818_v33, %v816_v31  ;;  %v1035_v12 = vpack.c.bf16 %v842_v10, %v840_v9  ;;  %v851_v31 = vld [vmem:[%s1758_s1 + $0x5c0] sm:$0xff]  ;;  %v856_v33 = vld [vmem:[%s1758_s1 + $0x5e8] sm:$0xff] }
  0x47   : > { %992 = vmatprep.subr.bf16.mxu0 %v991_v40  ;;  %v817_v40 = vld [vmem:[%s1758_s1 + $0x4b0] sm:$0xff] }
  0x48   : > { %918 = vmatpush1.bf16.msra.mxu1 %v917_v20  ;;  %v1013_v44 = vpack.c.bf16 %v817_v40, %v815_v39  ;;  %v845_v20 = vld [vmem:[%s1758_s1 + $0x590] sm:$0xff]  ;;  %v488_v40 = vld [vmem:[%s1235_s25] sm:$0x3c]  ;;  %s862_s25 = sshll.u32 %s1766_s12, 3 }
  0x49   : > { %480 = vmatmul.mubr.f32.vlgmr.msra.gmra.mrb[0].mxu0 %v411_v49  ;;  %920 = vmatprep.subr.bf16.mxu1 %v919_v22  ;;  %v824_v49 = vld [vmem:[%s1758_s1 + $0x4e8] sm:$0xff]  ;;  %v850_v22 = vld [vmem:[%s1758_s1 + $0x5b8] sm:$0xff]  ;;  %v1041_v23 = vpack.c.bf16 %v845_v20, %v843_v19  ;;  %s192_s5 = scalar_lea.vmem %s1760_s3, %s862_s25 }
  0x4a   : > { %994 = vmatpush1.bf16.msra.mxu0 %v993_v53  ;;  %625 = vmatprep.mubr.f32.mxu0 %v558_v0  ;;  %v1019_v52 = vpack.c.bf16 %v826_v50, %v824_v49  ;;  %v823_v53 = vld [vmem:[%s1758_s1 + $0x4e0] sm:$0xff]  ;;  %v1027_v0 = vpack.c.bf16 %v834_v62, %v832_v61  ;;  %v1043_v24 = vpack.c.bf16 %v850_v22, %v848_v21 }
  0x4b   : > { %996 = vmatprep.subr.bf16.mxu0 %v995_v55  ;;  %v828_v55 = vld [vmem:[%s1758_s1 + $0x508] sm:$0xff]  ;;  %v1021_v57 = vpack.c.bf16 %v825_v54, %v823_v53 }
  0x4c   : > { %922 = vmatpush1.bf16.msra.mxu1 %v921_v32  ;;  %v1023_v58 = vpack.c.bf16 %v830_v56, %v828_v55  ;;  %v853_v32 = vld [vmem:[%s1758_s1 + $0x5d0] sm:$0xff] }
  0x4d   : > { %924 = vmatprep.subr.bf16.mxu1 %v923_v34  ;;  %v858_v34 = vld [vmem:[%s1758_s1 + $0x5f8] sm:$0xff]  ;;  %v1049_v35 = vpack.c.bf16 %v853_v32, %v851_v31 }
  0x4e   : > { %998 = vmatpush1.bf16.msra.mxu0 %v997_v3  ;;  %v836_v3 = vld [vmem:[%s1758_s1 + $0x548] sm:$0xff]  ;;  %v1051_v36 = vpack.c.bf16 %v858_v34, %v856_v33 }
  0x4f   : > { %1000 = vmatprep.subr.bf16.mxu0 %v999_v4  ;;  %v838_v4 = vld [vmem:[%s1758_s1 + $0x558] sm:$0xff] }
  0x50   : > { %926 = vmatpush1.bf16.msra.mxu1 %v925_v41  ;;  %v1031_v6 = vpack.c.bf16 %v838_v4, %v836_v3  ;;  %v557_v41 = vrot.slane %v488_v40, 2 }
  0x52   : > { %1002 = vmatpush1.bf16.msra.mxu0 %v1001_v15  ;;  %v844_v15 = vld [vmem:[%s1758_s1 + $0x588] sm:$0xff] }
  0x53   : > { %1004 = vmatprep.subr.bf16.mxu0 %v1003_v16  ;;  %336 = vmatmul.mubr.f32.vlgmr.msra.gmra.mrb[0].mxu1 %v193_v48  ;;  %v846_v16 = vld [vmem:[%s1758_s1 + $0x598] sm:$0xff] }
  0x54   : > { %v1039_v18 = vpack.c.bf16 %v846_v16, %v844_v15 }
  0x56   : > { %1006 = vmatpush1.bf16.msra.mxu0 %v1005_v27  ;;  %v852_v27 = vld [vmem:[%s1758_s1 + $0x5c8] sm:$0xff] }
  0x57   : > { %1008 = vmatprep.subr.bf16.mxu0 %v1007_v28  ;;  %v854_v28 = vld [vmem:[%s1758_s1 + $0x5d8] sm:$0xff] }
  0x58   : > { %v1047_v30 = vpack.c.bf16 %v854_v28, %v852_v27 }
  0x5a   : > { %1010 = vmatpush1.bf16.msra.mxu0 %v1009_v37  ;;  %v855_v37 = vld [vmem:[%s1758_s1 + $0x5e0] sm:$0xff] }
  0x5b   : > { %1012 = vmatprep.subr.bf16.mxu0 %v1011_v38  ;;  %v857_v38 = vld [vmem:[%s1758_s1 + $0x5f0] sm:$0xff] }
  0x5c   : > { %v1053_v39 = vpack.c.bf16 %v857_v38, %v855_v37 }
  0x5e   : > { %1014 = vmatpush1.bf16.msra.mxu0 %v1013_v44  ;;  %v261_v44 = vlaneseq }
  0x5f   : > { %1016 = vmatprep.subr.bf16.mxu0 %v1015_v45 }
  0x60   : > { %v262_v45 = vshrl.u32 %v261_v44, 7 }
  0x62   : > { %1018 = vmatpush1.bf16.msra.mxu0 %v1017_v51  ;;  %v263_v46 = vsub.s32 0, %v262_v45  ;;  %v267_v48 = vsub.s32 1, %v262_v45 }
  0x63   : > { %1020 = vmatprep.subr.bf16.mxu0 %v1019_v52 }
  0x64   : > { %v264_v49 = vrot.slane %v259_v47, %v263_v46  ;;  %v268_v50 = vrot.slane %v259_v47, %v267_v48 }
  0x66   : > { %1022 = vmatpush1.bf16.msra.mxu0 %v1021_v57 }
  0x67   : > { %1024 = vmatprep.subr.bf16.mxu0 %v1023_v58 }
  0x6a   : > { %1026 = vmatpush1.bf16.msra.mxu0 %v1025_v63 }
  0x6b   : > { %1028 = vmatprep.subr.bf16.mxu0 %v1027_v0 }
  0x6e   : > { %1030 = vmatpush1.bf16.msra.mxu0 %v1029_v5 }
  0x6f   : > { %1032 = vmatprep.subr.bf16.mxu0 %v1031_v6 }
  0x72   : > { %1034 = vmatpush1.bf16.msra.mxu0 %v1033_v11 }
  0x73   : > { %1036 = vmatprep.subr.bf16.mxu0 %v1035_v12 }
  0x76   : > { %1038 = vmatpush1.bf16.msra.mxu0 %v1037_v17 }
  0x77   : > { %1040 = vmatprep.subr.bf16.mxu0 %v1039_v18 }
  0x7a   : > { %1042 = vmatpush1.bf16.msra.mxu0 %v1041_v23 }
  0x7b   : > { %1044 = vmatprep.subr.bf16.mxu0 %v1043_v24 }
  0x7e   : > { %1046 = vmatpush1.bf16.msra.mxu0 %v1045_v29 }
  0x7f   : > { %1048 = vmatprep.subr.bf16.mxu0 %v1047_v30 }
  0x82   : > { %1050 = vmatpush1.bf16.msra.mxu0 %v1049_v35 }
  0x83   : > { %1052 = vmatprep.subr.bf16.mxu0 %v1051_v36 }
  0x86   : > { %1054 = vmatpush1.bf16.msra.mxu0 %v1053_v39 }
  0x89   : > { %626 = vmatmul.mubr.f32.vlgmr.msra.gmra.mrb[0].mxu0 %v557_v41 }
 0x126   : > { %v337_v42 = vpop.f32.mrb[0].mxu1 }
 0x127   : > { %v339_v43 = vpop.f32.mrb[1].mxu1  ;;  %v338_v51 = vadd.f32 %v337_v42, %v264_v49 }
 0x128   : > { %v340_v52 = vadd.f32 %v339_v43, %v268_v50 }
 0x15c   : > { %v627_v53 = vpop.f32.mrb[0].mxu0 }
 0x15d   : > { %v1056_v54 = vadd.f32 %v627_v53, %v338_v51  ;;  %v629_v55 = vpop.f32.mrb[1].mxu0 }
 0x15e   : > { %v1058_v56 = vadd.f32 %v629_v55, %v340_v52 }
 0x160   : > { %v636_v57 = vcombine.low %v1056_v54, %v1058_v56 }
 0x162   : > { %638 = vst [vmem:[%s192_s5] sm:$0xff] %v636_v57 }
 0x163 PF: > { %s13_s14 = sadd.s32 1, %s1107_s14   ;;  %s1761_s12 = smov %s1103_s13 }
 0x164   : > { %p10_p5 = scmp.ge.s32.totalorder %s13_s14, 4   ;;  %s1762_s13 = smov %s1764_s15 }
 0x166   :  { %12 = sbr.rel (!%p10_p5) target bundleno = 2 (0x2), region = 64 }

// kernel: conv_autoencoder_forward.11
= control target key start
LH: loop header
LB: loop body
LE: loop exit
PB: predicated region body
PF: predicated region fallthrough
CT: control target
= control target key end

     0   :  { %s809_s12 = smov 0   ;;  %s811_s13 = smov 0   ;;  %s935_s0 = inlined_call_operand.vmem [shape: f32[2,18,64], index: 0, kind: input, shape index: {}]   ;;  %s936_s1 = inlined_call_operand.vmem [shape: f32[3,64,36], index: 1, kind: input, shape index: {}]   ;;  %s937_s2 = inlined_call_operand.vmem [shape: f32[1,36], index: 2, kind: input, shape index: {}]   ;;  %s938_s3 = inlined_call_operand.vmem [shape: f32[2,16,36], index: 3, kind: output, shape index: {}]  }
   0x1   :  { %s813_s14 = smov 0  }
   0x2 LB: > { %s25_s15 = sadd.s32 1, %s783_s13  ;;  %p569_p0 = scmp.ge.s32.totalorder %s787_s14, 1  ;;  %s787_s14 = sphi %s813_s14, %s13_s14   ;;  %s783_s13 = sphi %s811_s13, %s940_s13   ;;  %s779_s12 = sphi %s809_s12, %s939_s12  }
   0x3   : > { %p27_p1 = scmp.ge.s32.totalorder %s25_s15, 2  ;;  %p151_p2 = scmp.lt.s32.totalorder %s787_s14, 3 }
   0x5   : > { %s942_s15 = smov (%p27_p1, %s25_s15), 0  ;;  %p152_p3 = pnand %p569_p0, %p151_p2 }
   0x6   : > { %v576_v0 = vld [vmem:[%s936_s1 + $0x40] sm:$0xff] (!%p152_p3)  ;;  %v577_v1 = vld [vmem:[%s936_s1 + $0x48] sm:$0xff] (!%p152_p3)  ;;  %v578_v2 = vld [vmem:[%s936_s1 + $0x50] sm:$0xff] (!%p152_p3)  ;;  %p179_p4 = scmp.lt.s32.totalorder (!%p152_p3), %s779_s12, 1  ;;  %vm211_vm0 = vcmask (!%p152_p3), 523264   ;;  %vm481_vm1 = vcmask (!%p152_p3), 293888  }
   0x7   : > { %155 = sbr.rel (%p152_p3) target bundleno = 257 (0x101), region = 32  ;;  %v702_v3 = vpack.c.bf16 (!%p152_p3), %v577_v1, %v576_v0  ;;  %v579_v4 = vld [vmem:[%s936_s1 + $0x58] sm:$0xff] (!%p152_p3)  ;;  %v580_v6 = vld [vmem:[%s936_s1 + $0x60] sm:$0xff] (!%p152_p3)  ;;  %v581_v7 = vld [vmem:[%s936_s1 + $0x68] sm:$0xff] (!%p152_p3) }
   0x8   : > { %v706_v5 = vpack.c.bf16 (!%p152_p3), %v579_v4, %v578_v2  ;;  %v196_v8 = vld [vmem:[%s936_s1] sm:$0xff] (!%p152_p3)  ;;  %v197_v9 = vld [vmem:[%s936_s1 + $0x8] sm:$0xff] (!%p152_p3)  ;;  %v198_v11 = vld [vmem:[%s936_s1 + $0x10] sm:$0xff] (!%p152_p3)  ;;  %v710_v13 = vpack.c.bf16 (!%p152_p3), %v581_v7, %v580_v6 }
   0x9   : > { %703 = vmatprep.subr.bf16.mxu0 (!%p152_p3), %v702_v3  ;;  %v686_v10 = vpack.c.bf16 (!%p152_p3), %v197_v9, %v196_v8  ;;  %v199_v12 = vld [vmem:[%s936_s1 + $0x18] sm:$0xff] (!%p152_p3)  ;;  %v200_v15 = vld [vmem:[%s936_s1 + $0x20] sm:$0xff] (!%p152_p3)  ;;  %v201_v16 = vld [vmem:[%s936_s1 + $0x28] sm:$0xff] (!%p152_p3) }
   0xa   : > { %705 = vmatpush3.bf16.msra.mxu0 (!%p152_p3), %v702_v3  ;;  %v690_v14 = vpack.c.bf16 (!%p152_p3), %v199_v12, %v198_v11  ;;  %v582_v17 = vld [vmem:[%s936_s1 + $0x70] sm:$0xff] (!%p152_p3)  ;;  %v583_v18 = vld [vmem:[%s936_s1 + $0x78] sm:$0xff] (!%p152_p3)  ;;  %v694_v20 = vpack.c.bf16 (!%p152_p3), %v201_v16, %v200_v15  ;;  %v586_v25 = vld [vmem:[%s936_s1 + $0x80] sm:$0xff] (!%p152_p3) }
   0xb   : > { %707 = vmatprep.subr.bf16.mxu0 (!%p152_p3), %v706_v5  ;;  %687 = vmatprep.subr.bf16.mxu1 (!%p152_p3), %v686_v10  ;;  %v714_v22 = vpack.c.bf16 (!%p152_p3), %v583_v18, %v582_v17  ;;  %v202_v23 = vld [vmem:[%s936_s1 + $0x30] sm:$0xff] (!%p152_p3)  ;;  %v203_v24 = vld [vmem:[%s936_s1 + $0x38] sm:$0xff] (!%p152_p3)  ;;  %v587_v26 = vld [vmem:[%s936_s1 + $0x88] sm:$0xff] (!%p152_p3) }
   0xc   : > { %689 = vmatpush3.bf16.msra.mxu1 (!%p152_p3), %v686_v10  ;;  %v698_v27 = vpack.c.bf16 (!%p152_p3), %v203_v24, %v202_v23  ;;  %v718_v28 = vpack.c.bf16 (!%p152_p3), %v587_v26, %v586_v25  ;;  %v588_v29 = vld [vmem:[%s936_s1 + $0x90] sm:$0xff] (!%p152_p3)  ;;  %v589_v30 = vld [vmem:[%s936_s1 + $0x98] sm:$0xff] (!%p152_p3)  ;;  %v590_v34 = vld [vmem:[%s936_s1 + $0xa0] sm:$0xff] (!%p152_p3) }
   0xd   : > { %691 = vmatprep.subr.bf16.mxu1 (!%p152_p3), %v690_v14  ;;  %v722_v32 = vpack.c.bf16 (!%p152_p3), %v589_v30, %v588_v29  ;;  %v591_v35 = vld [vmem:[%s936_s1 + $0xa8] sm:$0xff] (!%p152_p3)  ;;  %v592_v38 = vld [vmem:[%s936_s1 + $0xb0] sm:$0xff] (!%p152_p3)  ;;  %v593_v39 = vld [vmem:[%s936_s1 + $0xb8] sm:$0xff] (!%p152_p3) }
   0xe   : > { %s944_s12 = smov (!%p179_p4, %s779_s12), 1  ;;  %709 = vmatpush3.bf16.msra.mxu0 %v706_v5  ;;  %v726_v37 = vpack.c.bf16 %v591_v35, %v590_v34  ;;  %v730_v40 = vpack.c.bf16 %v593_v39, %v592_v38  ;;  %v573_v44 = vld [vmem:[%s937_s2] ss:$0 sm:$0xff] }
   0xf   : > { %s740_s5 = smul.u32 24, %s944_s12  ;;  %711 = vmatprep.subr.bf16.mxu0 %v710_v13  ;;  %s598_s25 = sshll.u32 %s944_s12, 4 }
  0x10   : > { %693 = vmatpush3.bf16.msra.mxu1 %v690_v14  ;;  %s192_s28 = scalar_lea.vmem %s938_s3, %s598_s25 }
  0x11   : > { %s875_s24 = scalar_lea.vmem %s935_s0, %s740_s5  ;;  %695 = vmatprep.subr.bf16.mxu1 %v694_v20 }
  0x12   : > { %v293_v19 = vld [vmem:[%s875_s24 + $0x1] sm:$0xff]  ;;  %713 = vmatpush3.bf16.msra.mxu0 %v710_v13  ;;  %v294_v31 = vld [vmem:[%s875_s24 + $0x9] sm:$0xff] }
  0x13   : > { %664 = vmatprep.mubr.msk.f32.mxu0 %vm211_vm0, %v293_v19  ;;  %v194_v21 = vld [vmem:[%s875_s24] sm:$0xff]  ;;  %715 = vmatprep.subr.bf16.mxu0 %v714_v22  ;;  %v195_v36 = vld [vmem:[%s875_s24 + $0x8] sm:$0xff] }
  0x14   : > { %645 = vmatprep.mubr.msk.f32.mxu1 %vm211_vm0, %v194_v21  ;;  %697 = vmatpush3.bf16.msra.mxu1 %v694_v20  ;;  %v387_v33 = vld [vmem:[%s875_s24 + $0x2] sm:$0xff]  ;;  %v388_v41 = vld [vmem:[%s875_s24 + $0xa] sm:$0xff] }
  0x15   : > { %699 = vmatprep.subr.bf16.mxu1 %v698_v27 }
  0x16   : > { %717 = vmatpush3.bf16.msra.mxu0 %v714_v22 }
  0x17   : > { %719 = vmatprep.subr.bf16.mxu0 %v718_v28 }
  0x18   : > { %701 = vmatpush3.bf16.msra.mxu1 %v698_v27 }
  0x19   : > { %665 = vmatmul.mubr.msk.f32.vlgmr.msra.gmra.mrb[0].mxu0 %vm211_vm0, %v294_v31 }
  0x1a   : > { %721 = vmatpush3.bf16.msra.mxu0 %v718_v28  ;;  %683 = vmatprep.mubr.msk.f32.mxu0 %vm211_vm0, %v387_v33 }
  0x1b   : > { %723 = vmatprep.subr.bf16.mxu0 %v722_v32  ;;  %646 = vmatmul.mubr.msk.f32.vlgmr.msra.gmra.mrb[0].mxu1 %vm211_vm0, %v195_v36 }
  0x1e   : > { %725 = vmatpush3.bf16.msra.mxu0 %v722_v32 }
  0x1f   : > { %727 = vmatprep.subr.bf16.mxu0 %v726_v37 }
  0x22   : > { %729 = vmatpush3.bf16.msra.mxu0 %v726_v37 }
  0x23   : > { %731 = vmatprep.subr.bf16.mxu0 %v730_v40 }
  0x26   : > { %733 = vmatpush3.bf16.msra.mxu0 %v730_v40 }
  0x29   : > { %684 = vmatmul.mubr.msk.f32.vlgmr.msra.gmra.mrb[0].mxu0 %vm211_vm0, %v388_v41 }
  0xee   : > { %v647_v42 = vpop.f32.mrb[0].mxu1 }
  0xef   : > { %v284_v43 = vpop.f32.mrb[1].mxu1  ;;  %v290_v45 = vadd.f32 %v647_v42, %v573_v44 }
  0xf0   : > { %v285_v46 = vadd.f32 %v573_v44, %v284_v43 }
  0xfc   : > { %v685_v47 = vpop.f32.mrb[0].mxu0 }
  0xfd   : > { %v735_v48 = vadd.f32 %v685_v47, %v290_v45  ;;  %v470_v49 = vpop.f32.mrb[1].mxu0 }
  0xfe   : > { %v737_v50 = vadd.f32 %v470_v49, %v285_v46 }
  0xff   : > { %483 = vst.msk [vmem:[%s192_s28 + $0x8] sm:$0xff] %vm481_vm1, %v735_v48 }
 0x100   : > { %482 = vst.msk [vmem:[%s192_s28] sm:$0xff] %vm481_vm1, %v737_v50 }
 0x101 PF: > { %s13_s14 = sadd.s32 1, %s787_s14   ;;  %s939_s12 = smov %s783_s13 }
 0x102   : > { %p10_p5 = scmp.ge.s32.totalorder %s13_s14, 4   ;;  %s940_s13 = smov %s942_s15 }
 0x104   :  { %12 = sbr.rel (!%p10_p5) target bundleno = 2 (0x2), region = 64 }

</bundles_post_ra>
